<compile_context>
chip_gen: v5e
topology: v5e:2x2
jax: 0.10.0
libtpu: 0.0.40
codegen_flags: <defaults>
</compile_context>

<pallas_src>
import jax
import jax.numpy as jnp
from jax.experimental import pallas as pl
from jax.experimental.pallas import tpu as pltpu


def meta_recurrence_kernel(
    head_ref, loss_ref,                         # scalar prefetch (SMEM)
    grads_ref, cI_ref,                          # streamed / resident per-P-tile inputs
    w_ih_ref, w_hh_ref, b_ref, wfi_ref,         # resident weights
    h_out, cS_out,                              # outputs (written at t == T-1)
    h_sc, c_sc, fS_sc, iS_sc, cS_sc,            # VMEM scratch: recurrent state
):
    H = h_sc.shape[0]
    t = pl.program_id(1)
    T = pl.num_programs(1)

    # ---- state init at the first meta step of this parameter tile ----
    @pl.when(t == 0)
    def _():
        h_sc[...] = jnp.zeros_like(h_sc)
        c_sc[...] = jnp.zeros_like(c_sc)
        fS_sc[...] = jnp.zeros_like(fS_sc)
        iS_sc[...] = jnp.zeros_like(iS_sc)
        cS_sc[...] = cI_ref[...]                # cell_0.cI = initial learner params

    grad = grads_ref[0]                         # (1, Pt)  current flat learner grads
    loss = loss_ref[t]                          # scalar loss for this meta step

    h = h_sc[...]                               # (H, Pt)
    c = c_sc[...]                               # (H, Pt)

    # ---- nn.LSTM cell, single time step (feature-major, gates (4H, Pt)) ----
    gates = (
        jnp.dot(w_hh_ref[...], h, preferred_element_type=jnp.float32)
        + w_ih_ref[:, 0:1] * grad               # (4H,1) * (1,Pt) -> (4H,Pt)
        + w_ih_ref[:, 1:2] * loss               # loss broadcast (VPU)
        + b_ref[...]                            # (4H,1) bias (b_ih + b_hh)
    )
    i_g = jax.nn.sigmoid(gates[0 * H:1 * H, :])
    f_g = jax.nn.sigmoid(gates[1 * H:2 * H, :])
    g_g = jnp.tanh(gates[2 * H:3 * H, :])
    o_g = jax.nn.sigmoid(gates[3 * H:4 * H, :])
    c_new = f_g * c + i_g * g_g
    h_new = o_g * jnp.tanh(c_new)
    h_sc[...] = h_new
    c_sc[...] = c_new

    # ---- MetaLSTM cell: next learner parameters ----
    cS = cS_sc[...]                             # (1, Pt)
    fS_prev = fS_sc[...]
    iS_prev = iS_sc[...]

    # fused head: [WF_x ; WI_x] (2,H) @ h_new (H,Pt) -> (2, Pt)
    fi = jnp.dot(wfi_ref[...], h_new, preferred_element_type=jnp.float32)

    wf_c, wf_f, bf = head_ref[0], head_ref[1], head_ref[2]
    wi_c, wi_f, bi = head_ref[3], head_ref[4], head_ref[5]

    fS_new = jax.nn.sigmoid(fi[0:1, :] + wf_c * cS + wf_f * fS_prev + bf)
    iS_new = jax.nn.sigmoid(fi[1:2, :] + wi_c * cS + wi_f * iS_prev + bi)
    cS_new = fS_new * cS - iS_new * grad

    fS_sc[...] = fS_new
    iS_sc[...] = iS_new
    cS_sc[...] = cS_new

    # ---- emit only the final state of this parameter tile ----
    @pl.when(t == T - 1)
    def _():
        h_out[...] = h_new
        cS_out[...] = cS_new


def _choose_p_tile(P):
    # Prefer lane-dense tiles with at least 2 tiles (so the P axis can spread over
    # v7x's 2 TensorCores); fall back to the biggest clean divisor, else whole P.
    for cand in (512, 256, 128):
        if P % cand == 0 and P // cand >= 2:
            return cand
    for cand in (512, 256, 128):
        if P % cand == 0:
            return cand
    return P


@jax.jit
def metalearner_forward(params, grads_per_step, losses_per_step):
    """Runs the full meta-update recurrence (lstm + lstm2 of MetaLearner.forward)
    in a single fused Pallas kernel.

    grads_per_step : (T, P) flattened learner gradients per meta step (f32).
    losses_per_step: (T,)   scalar learner losses per meta step.
    Returns (cS, h): final flat learner parameters (P, 1) and LSTM hidden (P, H).
    """
    T, P = grads_per_step.shape
    fourH, H = params["w_hh"].shape
    assert fourH == 4 * H
    p_tile = _choose_p_tile(P)
    num_p = P // p_tile if P % p_tile == 0 else 1

    # Feature-major inputs. (T,1,P) keeps the grad block's last-two dims TPU-legal.
    # TODO(synk): grads could be stored bf16 (cast in-kernel) to halve stream traffic
    # if meta-training tolerates it; kept f32 for exact reference semantics.
    grads3 = grads_per_step.reshape(T, 1, P)
    cI = params["cI"].reshape(1, P)

    idx_w = lambda p, t, *_: (0, 0)             # resident weights

    h_fm, cS_fm = pl.pallas_call(
        meta_recurrence_kernel,
        out_shape=(
            jax.ShapeDtypeStruct((H, P), jnp.float32),   # h_final (feature-major)
            jax.ShapeDtypeStruct((1, P), jnp.float32),   # cS_final (new learner params)
        ),
        grid_spec=pltpu.PrefetchScalarGridSpec(
            num_scalar_prefetch=2,              # head_scalars, losses -> SMEM
            grid=(num_p, T),
            in_specs=[
                pl.BlockSpec((1, 1, p_tile), lambda p, t, *_: (t, 0, p)),   # grads
                pl.BlockSpec((1, p_tile), lambda p, t, *_: (0, p)),         # cI
                pl.BlockSpec((4 * H, 2), idx_w),                            # w_ih
                pl.BlockSpec((4 * H, H), idx_w),                            # w_hh
                pl.BlockSpec((4 * H, 1), idx_w),                            # b
                pl.BlockSpec((2, H), idx_w),                                # wfi_x
            ],
            out_specs=[
                pl.BlockSpec((H, p_tile), lambda p, t, *_: (0, p)),
                pl.BlockSpec((1, p_tile), lambda p, t, *_: (0, p)),
            ],
            scratch_shapes=[
                pltpu.VMEM((H, p_tile), jnp.float32),    # h
                pltpu.VMEM((H, p_tile), jnp.float32),    # c
                pltpu.VMEM((1, p_tile), jnp.float32),    # fS
                pltpu.VMEM((1, p_tile), jnp.float32),    # iS
                pltpu.VMEM((1, p_tile), jnp.float32),    # cS
            ],
        ),
        compiler_params=pltpu.CompilerParams(
            dimension_semantics=("parallel", "arbitrary"),
            vmem_limit_bytes=32 * 1024 * 1024,   # safe on v7x (64 MiB phys) too
        ),
    )(params["head_scalars"], losses_per_step,
      grads3, cI, params["w_ih"], params["w_hh"], params["b"], params["wfi_x"])

    return cS_fm.reshape(P, 1), h_fm.T


def init_params(key, nParams, nHidden):
    H = nHidden
    ks = jax.random.split(key, 12)
    u = lambda k, shape, lo, hi: jax.random.uniform(
        k, shape, dtype=jnp.float32, minval=lo, maxval=hi)

    # nn.LSTM weights (PyTorch layout: weight_ih_l0 (4H,2), weight_hh_l0 (4H,H),
    # gate order i,f,g,o), uniform(-0.01, 0.01) as in __init__.
    w_ih = u(ks[0], (4 * H, 2), -0.01, 0.01)
    w_hh = u(ks[1], (4 * H, H), -0.01, 0.01)
    b_ih = u(ks[2], (4 * H,), -0.01, 0.01)
    b_hh = u(ks[3], (4 * H,), -0.01, 0.01)
    b = (b_ih + b_hh).reshape(4 * H, 1)

    # MetaLSTM: WF/WI (H+2, 1) uniform(-0.01, 0.01); bF ~ U(4,5); bI ~ U(-5,-4).
    WF = u(ks[4], (H + 2, 1), -0.01, 0.01)
    WI = u(ks[5], (H + 2, 1), -0.01, 0.01)
    bF = u(ks[6], (), 4.0, 5.0)
    bI = u(ks[7], (), -5.0, -4.0)
    # cI := flattened initial learner params (synthetic, deterministic).
    cI = u(ks[8], (nParams,), -0.1, 0.1)

    wfi_x = jnp.concatenate([WF[:H].T, WI[:H].T], axis=0)        # (2, H)
    head_scalars = jnp.stack(
        [WF[H, 0], WF[H + 1, 0], bF, WI[H, 0], WI[H + 1, 0], bI]
    ).astype(jnp.float32)                                        # (6,) in SMEM

    return dict(w_ih=w_ih, w_hh=w_hh, b=b, wfi_x=wfi_x,
                head_scalars=head_scalars, cI=cI)


if __name__ == "__main__":
    nParams = 256          # opt['nParams']
    nHidden = 32           # opt['nHidden']
    steps = 2
    inner_batches = 2      # trainSize // batchSize
    T = steps * inner_batches

    key = jax.random.PRNGKey(0)
    k_param, k_grad, k_loss = jax.random.split(key, 3)
    params = init_params(k_param, nParams, nHidden)

    # Deterministic synthetic learner gradients / losses per meta step.
    grads = jax.random.normal(k_grad, (T, nParams), dtype=jnp.float32) * 0.1
    losses = jax.random.uniform(k_loss, (T,), dtype=jnp.float32)

    cS_final, h_final = metalearner_forward(params, grads, losses)
    jax.block_until_ready((cS_final, h_final))

    assert cS_final.shape == (nParams, 1) and cS_final.dtype == jnp.float32
    assert h_final.shape == (nParams, nHidden)
    assert bool(jnp.all(jnp.isfinite(cS_final)))
    assert bool(jnp.all(jnp.isfinite(h_final)))
    print("KERNEL_OK")
</pallas_src>

<mosaic_0001>
module attributes {stable_mosaic.version = 11 : i64} {
  func.func @meta_recurrence_kernel(%arg0: i32, %arg1: i32, %arg2: memref<6xf32, #tpu.memory_space<smem>>, %arg3: memref<4xf32, #tpu.memory_space<smem>>, %arg4: memref<1x1x128xf32, #tpu.memory_space<vmem>>, %arg5: memref<1x128xf32, #tpu.memory_space<vmem>>, %arg6: memref<128x2xf32, #tpu.memory_space<vmem>>, %arg7: memref<128x32xf32, #tpu.memory_space<vmem>>, %arg8: memref<128x1xf32, #tpu.memory_space<vmem>>, %arg9: memref<2x32xf32, #tpu.memory_space<vmem>>, %arg10: memref<32x128xf32, #tpu.memory_space<vmem>>, %arg11: memref<1x128xf32, #tpu.memory_space<vmem>>, %arg12: memref<32x128xf32, #tpu.memory_space<vmem>>, %arg13: memref<32x128xf32, #tpu.memory_space<vmem>>, %arg14: memref<1x128xf32, #tpu.memory_space<vmem>>, %arg15: memref<1x128xf32, #tpu.memory_space<vmem>>, %arg16: memref<1x128xf32, #tpu.memory_space<vmem>>) attributes {dimension_semantics = [#tpu.dimension_semantics<parallel>, #tpu.dimension_semantics<arbitrary>], iteration_bounds = array<i64: 2, 4>, scalar_prefetch = 2 : i64, scratch_operands = 5 : i64, tpu.core_type = #tpu.core_type<tc>, window_params = [{transform_indices = @transform_0, window_bounds = array<i64: 1, 1, 128>}, {transform_indices = @transform_1, window_bounds = array<i64: 1, 128>}, {pipeline_mode = #tpu.pipeline_mode<synchronous>, transform_indices = @transform_2, window_bounds = array<i64: 128, 2>}, {pipeline_mode = #tpu.pipeline_mode<synchronous>, transform_indices = @transform_3, window_bounds = array<i64: 128, 32>}, {pipeline_mode = #tpu.pipeline_mode<synchronous>, transform_indices = @transform_4, window_bounds = array<i64: 128, 1>}, {pipeline_mode = #tpu.pipeline_mode<synchronous>, transform_indices = @transform_5, window_bounds = array<i64: 2, 32>}, {transform_indices = @transform_6, window_bounds = array<i64: 32, 128>}, {transform_indices = @transform_7, window_bounds = array<i64: 1, 128>}]} {
    %c0_i32 = arith.constant 0 : i32
    %0 = arith.cmpi eq, %arg1, %c0_i32 : i32
    %1 = arith.extui %0 : i1 to i32
    %c0_i32_0 = arith.constant 0 : i32
    %2 = arith.cmpi ne, %1, %c0_i32_0 : i32
    scf.if %2 {
      %cst_41 = arith.constant 0.000000e+00 : f32
      %99 = vector.broadcast %cst_41 : f32 to vector<32x128xf32>
      %c0_42 = arith.constant 0 : index
      %c0_43 = arith.constant 0 : index
      %100 = vector.load %arg12[%c0_42, %c0_43] : memref<32x128xf32, #tpu.memory_space<vmem>>, vector<32x128xf32>
      tpu.vector_store %arg12[%c0_42, %c0_43], %99 {strides = array<i32>} : memref<32x128xf32, #tpu.memory_space<vmem>>, vector<32x128xf32>,
      %cst_44 = arith.constant 0.000000e+00 : f32
      %101 = vector.broadcast %cst_44 : f32 to vector<32x128xf32>
      %c0_45 = arith.constant 0 : index
      %c0_46 = arith.constant 0 : index
      %102 = vector.load %arg13[%c0_45, %c0_46] : memref<32x128xf32, #tpu.memory_space<vmem>>, vector<32x128xf32>
      tpu.vector_store %arg13[%c0_45, %c0_46], %101 {strides = array<i32>} : memref<32x128xf32, #tpu.memory_space<vmem>>, vector<32x128xf32>,
      %cst_47 = arith.constant 0.000000e+00 : f32
      %103 = vector.broadcast %cst_47 : f32 to vector<1x128xf32>
      %c0_48 = arith.constant 0 : index
      %c0_49 = arith.constant 0 : index
      %104 = vector.load %arg14[%c0_48, %c0_49] : memref<1x128xf32, #tpu.memory_space<vmem>>, vector<1x128xf32>
      tpu.vector_store %arg14[%c0_48, %c0_49], %103 {strides = array<i32>} : memref<1x128xf32, #tpu.memory_space<vmem>>, vector<1x128xf32>,
      %cst_50 = arith.constant 0.000000e+00 : f32
      %105 = vector.broadcast %cst_50 : f32 to vector<1x128xf32>
      %c0_51 = arith.constant 0 : index
      %c0_52 = arith.constant 0 : index
      %106 = vector.load %arg15[%c0_51, %c0_52] : memref<1x128xf32, #tpu.memory_space<vmem>>, vector<1x128xf32>
      tpu.vector_store %arg15[%c0_51, %c0_52], %105 {strides = array<i32>} : memref<1x128xf32, #tpu.memory_space<vmem>>, vector<1x128xf32>,
      %c0_53 = arith.constant 0 : index
      %c0_54 = arith.constant 0 : index
      %107 = vector.load %arg5[%c0_53, %c0_54] : memref<1x128xf32, #tpu.memory_space<vmem>>, vector<1x128xf32>
      %c0_55 = arith.constant 0 : index
      %c0_56 = arith.constant 0 : index
      %108 = vector.load %arg16[%c0_55, %c0_56] : memref<1x128xf32, #tpu.memory_space<vmem>>, vector<1x128xf32>
      tpu.vector_store %arg16[%c0_55, %c0_56], %107 {strides = array<i32>} : memref<1x128xf32, #tpu.memory_space<vmem>>, vector<1x128xf32>,
    } else {
    }
    %c0 = arith.constant 0 : index
    %c0_1 = arith.constant 0 : index
    %c0_2 = arith.constant 0 : index
    %3 = vector.load %arg4[%c0, %c0_1, %c0_2] : memref<1x1x128xf32, #tpu.memory_space<vmem>>, vector<1x1x128xf32>
    %4 = vector.shape_cast %3 : vector<1x1x128xf32> to vector<1x128xf32>
    %5 = arith.index_cast %arg1 : i32 to index
    %6 = memref.load %arg3[%5] : memref<4xf32, #tpu.memory_space<smem>>
    %c0_3 = arith.constant 0 : index
    %c0_4 = arith.constant 0 : index
    %7 = vector.load %arg12[%c0_3, %c0_4] : memref<32x128xf32, #tpu.memory_space<vmem>>, vector<32x128xf32>
    %c0_5 = arith.constant 0 : index
    %c0_6 = arith.constant 0 : index
    %8 = vector.load %arg13[%c0_5, %c0_6] : memref<32x128xf32, #tpu.memory_space<vmem>>, vector<32x128xf32>
    %c0_7 = arith.constant 0 : index
    %c0_8 = arith.constant 0 : index
    %9 = vector.load %arg7[%c0_7, %c0_8] : memref<128x32xf32, #tpu.memory_space<vmem>>, vector<128x32xf32>
    %cst = arith.constant dense<0.000000e+00> : vector<128x128xf32>
    %10 = tpu.matmul %9, %7, %cst {dimension_numbers = #tpu.dot_dimension_numbers<[1], [0], [0], [1], [0, 0, 1, 1], [], []>} : vector<128x32xf32>, vector<32x128xf32>, vector<128x128xf32> -> vector<128x128xf32>
    %c0_9 = arith.constant 0 : index
    %c0_10 = arith.constant 0 : index
    %11 = vector.load %arg6[%c0_9, %c0_10] : memref<128x2xf32, #tpu.memory_space<vmem>>, vector<128x1xf32>
    %12 = vector.broadcast %11 : vector<128x1xf32> to vector<128x128xf32>
    %13 = vector.broadcast %4 : vector<1x128xf32> to vector<128x128xf32>
    %14 = arith.mulf %12, %13 : vector<128x128xf32>
    %15 = arith.addf %10, %14 : vector<128x128xf32>
    %c0_11 = arith.constant 0 : index
    %c1 = arith.constant 1 : index
    %16 = vector.load %arg6[%c0_11, %c1] : memref<128x2xf32, #tpu.memory_space<vmem>>, vector<128x1xf32>
    %17 = vector.broadcast %6 : f32 to vector<128x1xf32>
    %18 = arith.mulf %16, %17 : vector<128x1xf32>
    %19 = vector.broadcast %18 : vector<128x1xf32> to vector<128x128xf32>
    %20 = arith.addf %15, %19 : vector<128x128xf32>
    %c0_12 = arith.constant 0 : index
    %c0_13 = arith.constant 0 : index
    %21 = vector.load %arg8[%c0_12, %c0_13] : memref<128x1xf32, #tpu.memory_space<vmem>>, vector<128x1xf32>
    %22 = vector.broadcast %21 : vector<128x1xf32> to vector<128x128xf32>
    %23 = arith.addf %20, %22 : vector<128x128xf32>
    %24 = vector.extract_strided_slice %23 {offsets = [0, 0], sizes = [32, 128], strides = [1, 1]} : vector<128x128xf32> to vector<32x128xf32>
    %25 = arith.negf %24 : vector<32x128xf32>
    %26 = math.exp %25 : vector<32x128xf32>
    %cst_14 = arith.constant 1.000000e+00 : f32
    %27 = vector.broadcast %cst_14 : f32 to vector<32x128xf32>
    %28 = arith.addf %27, %26 : vector<32x128xf32>
    %29 = arith.divf %27, %28 : vector<32x128xf32>
    %30 = vector.extract_strided_slice %23 {offsets = [32, 0], sizes = [32, 128], strides = [1, 1]} : vector<128x128xf32> to vector<32x128xf32>
    %31 = arith.negf %30 : vector<32x128xf32>
    %32 = math.exp %31 : vector<32x128xf32>
    %cst_15 = arith.constant 1.000000e+00 : f32
    %33 = vector.broadcast %cst_15 : f32 to vector<32x128xf32>
    %34 = arith.addf %33, %32 : vector<32x128xf32>
    %35 = arith.divf %33, %34 : vector<32x128xf32>
    %36 = vector.extract_strided_slice %23 {offsets = [64, 0], sizes = [32, 128], strides = [1, 1]} : vector<128x128xf32> to vector<32x128xf32>
    %37 = math.tanh %36 : vector<32x128xf32>
    %38 = vector.extract_strided_slice %23 {offsets = [96, 0], sizes = [32, 128], strides = [1, 1]} : vector<128x128xf32> to vector<32x128xf32>
    %39 = arith.negf %38 : vector<32x128xf32>
    %40 = math.exp %39 : vector<32x128xf32>
    %cst_16 = arith.constant 1.000000e+00 : f32
    %41 = vector.broadcast %cst_16 : f32 to vector<32x128xf32>
    %42 = arith.addf %41, %40 : vector<32x128xf32>
    %43 = arith.divf %41, %42 : vector<32x128xf32>
    %44 = arith.mulf %35, %8 : vector<32x128xf32>
    %45 = arith.mulf %29, %37 : vector<32x128xf32>
    %46 = arith.addf %44, %45 : vector<32x128xf32>
    %47 = math.tanh %46 : vector<32x128xf32>
    %48 = arith.mulf %43, %47 : vector<32x128xf32>
    %c0_17 = arith.constant 0 : index
    %c0_18 = arith.constant 0 : index
    %49 = vector.load %arg12[%c0_17, %c0_18] : memref<32x128xf32, #tpu.memory_space<vmem>>, vector<32x128xf32>
    tpu.vector_store %arg12[%c0_17, %c0_18], %48 {strides = array<i32>} : memref<32x128xf32, #tpu.memory_space<vmem>>, vector<32x128xf32>,
    %c0_19 = arith.constant 0 : index
    %c0_20 = arith.constant 0 : index
    %50 = vector.load %arg13[%c0_19, %c0_20] : memref<32x128xf32, #tpu.memory_space<vmem>>, vector<32x128xf32>
    tpu.vector_store %arg13[%c0_19, %c0_20], %46 {strides = array<i32>} : memref<32x128xf32, #tpu.memory_space<vmem>>, vector<32x128xf32>,
    %c0_21 = arith.constant 0 : index
    %c0_22 = arith.constant 0 : index
    %51 = vector.load %arg16[%c0_21, %c0_22] : memref<1x128xf32, #tpu.memory_space<vmem>>, vector<1x128xf32>
    %c0_23 = arith.constant 0 : index
    %c0_24 = arith.constant 0 : index
    %52 = vector.load %arg14[%c0_23, %c0_24] : memref<1x128xf32, #tpu.memory_space<vmem>>, vector<1x128xf32>
    %c0_25 = arith.constant 0 : index
    %c0_26 = arith.constant 0 : index
    %53 = vector.load %arg15[%c0_25, %c0_26] : memref<1x128xf32, #tpu.memory_space<vmem>>, vector<1x128xf32>
    %c0_27 = arith.constant 0 : index
    %c0_28 = arith.constant 0 : index
    %54 = vector.load %arg9[%c0_27, %c0_28] : memref<2x32xf32, #tpu.memory_space<vmem>>, vector<2x32xf32>
    %cst_29 = arith.constant dense<0.000000e+00> : vector<2x128xf32>
    %55 = tpu.matmul %54, %48, %cst_29 {dimension_numbers = #tpu.dot_dimension_numbers<[1], [0], [0], [1], [0, 0, 1, 1], [], []>} : vector<2x32xf32>, vector<32x128xf32>, vector<2x128xf32> -> vector<2x128xf32>
    %c0_30 = arith.constant 0 : index
    %56 = memref.load %arg2[%c0_30] : memref<6xf32, #tpu.memory_space<smem>>
    %c1_31 = arith.constant 1 : index
    %57 = memref.load %arg2[%c1_31] : memref<6xf32, #tpu.memory_space<smem>>
    %c2 = arith.constant 2 : index
    %58 = memref.load %arg2[%c2] : memref<6xf32, #tpu.memory_space<smem>>
    %c3 = arith.constant 3 : index
    %59 = memref.load %arg2[%c3] : memref<6xf32, #tpu.memory_space<smem>>
    %c4 = arith.constant 4 : index
    %60 = memref.load %arg2[%c4] : memref<6xf32, #tpu.memory_space<smem>>
    %c5 = arith.constant 5 : index
    %61 = memref.load %arg2[%c5] : memref<6xf32, #tpu.memory_space<smem>>
    %62 = vector.extract_strided_slice %55 {offsets = [0, 0], sizes = [1, 128], strides = [1, 1]} : vector<2x128xf32> to vector<1x128xf32>
    %63 = vector.broadcast %56 : f32 to vector<1x128xf32>
    %64 = arith.mulf %63, %51 : vector<1x128xf32>
    %65 = arith.addf %62, %64 : vector<1x128xf32>
    %66 = vector.broadcast %57 : f32 to vector<1x128xf32>
    %67 = arith.mulf %66, %52 : vector<1x128xf32>
    %68 = arith.addf %65, %67 : vector<1x128xf32>
    %69 = vector.broadcast %58 : f32 to vector<1x128xf32>
    %70 = arith.addf %68, %69 : vector<1x128xf32>
    %71 = arith.negf %70 : vector<1x128xf32>
    %72 = math.exp %71 : vector<1x128xf32>
    %cst_32 = arith.constant 1.000000e+00 : f32
    %73 = vector.broadcast %cst_32 : f32 to vector<1x128xf32>
    %74 = arith.addf %73, %72 : vector<1x128xf32>
    %75 = arith.divf %73, %74 : vector<1x128xf32>
    %76 = vector.extract_strided_slice %55 {offsets = [1, 0], sizes = [1, 128], strides = [1, 1]} : vector<2x128xf32> to vector<1x128xf32>
    %77 = vector.broadcast %59 : f32 to vector<1x128xf32>
    %78 = arith.mulf %77, %51 : vector<1x128xf32>
    %79 = arith.addf %76, %78 : vector<1x128xf32>
    %80 = vector.broadcast %60 : f32 to vector<1x128xf32>
    %81 = arith.mulf %80, %53 : vector<1x128xf32>
    %82 = arith.addf %79, %81 : vector<1x128xf32>
    %83 = vector.broadcast %61 : f32 to vector<1x128xf32>
    %84 = arith.addf %82, %83 : vector<1x128xf32>
    %85 = arith.negf %84 : vector<1x128xf32>
    %86 = math.exp %85 : vector<1x128xf32>
    %cst_33 = arith.constant 1.000000e+00 : f32
    %87 = vector.broadcast %cst_33 : f32 to vector<1x128xf32>
    %88 = arith.addf %87, %86 : vector<1x128xf32>
    %89 = arith.divf %87, %88 : vector<1x128xf32>
    %90 = arith.mulf %75, %51 : vector<1x128xf32>
    %91 = arith.mulf %89, %4 : vector<1x128xf32>
    %92 = arith.subf %90, %91 : vector<1x128xf32>
    %c0_34 = arith.constant 0 : index
    %c0_35 = arith.constant 0 : index
    %93 = vector.load %arg14[%c0_34, %c0_35] : memref<1x128xf32, #tpu.memory_space<vmem>>, vector<1x128xf32>
    tpu.vector_store %arg14[%c0_34, %c0_35], %75 {strides = array<i32>} : memref<1x128xf32, #tpu.memory_space<vmem>>, vector<1x128xf32>,
    %c0_36 = arith.constant 0 : index
    %c0_37 = arith.constant 0 : index
    %94 = vector.load %arg15[%c0_36, %c0_37] : memref<1x128xf32, #tpu.memory_space<vmem>>, vector<1x128xf32>
    tpu.vector_store %arg15[%c0_36, %c0_37], %89 {strides = array<i32>} : memref<1x128xf32, #tpu.memory_space<vmem>>, vector<1x128xf32>,
    %c0_38 = arith.constant 0 : index
    %c0_39 = arith.constant 0 : index
    %95 = vector.load %arg16[%c0_38, %c0_39] : memref<1x128xf32, #tpu.memory_space<vmem>>, vector<1x128xf32>
    tpu.vector_store %arg16[%c0_38, %c0_39], %92 {strides = array<i32>} : memref<1x128xf32, #tpu.memory_space<vmem>>, vector<1x128xf32>,
    %c3_i32 = arith.constant 3 : i32
    %96 = arith.cmpi eq, %arg1, %c3_i32 : i32
    %97 = arith.extui %96 : i1 to i32
    %c0_i32_40 = arith.constant 0 : i32
    %98 = arith.cmpi ne, %97, %c0_i32_40 : i32
    scf.if %98 {
      %c0_41 = arith.constant 0 : index
      %c0_42 = arith.constant 0 : index
      %99 = vector.load %arg10[%c0_41, %c0_42] : memref<32x128xf32, #tpu.memory_space<vmem>>, vector<32x128xf32>
      tpu.vector_store %arg10[%c0_41, %c0_42], %48 {strides = array<i32>} : memref<32x128xf32, #tpu.memory_space<vmem>>, vector<32x128xf32>,
      %c0_43 = arith.constant 0 : index
      %c0_44 = arith.constant 0 : index
      %100 = vector.load %arg11[%c0_43, %c0_44] : memref<1x128xf32, #tpu.memory_space<vmem>>, vector<1x128xf32>
      tpu.vector_store %arg11[%c0_43, %c0_44], %92 {strides = array<i32>} : memref<1x128xf32, #tpu.memory_space<vmem>>, vector<1x128xf32>,
    } else {
    }
    return
  }
  func.func @transform_0(%arg0: i32, %arg1: i32, %arg2: memref<6xf32, #tpu.memory_space<smem>>, %arg3: memref<4xf32, #tpu.memory_space<smem>>) -> (i32, i32, i32) {
    %c0_i32 = arith.constant 0 : i32
    %c0_i32_0 = arith.constant 0 : i32
    return %arg1, %c0_i32, %arg0 : i32, i32, i32
  }
  func.func @transform_1(%arg0: i32, %arg1: i32, %arg2: memref<6xf32, #tpu.memory_space<smem>>, %arg3: memref<4xf32, #tpu.memory_space<smem>>) -> (i32, i32) {
    %c0_i32 = arith.constant 0 : i32
    %c0_i32_0 = arith.constant 0 : i32
    return %c0_i32, %arg0 : i32, i32
  }
  func.func @transform_2(%arg0: i32, %arg1: i32, %arg2: memref<6xf32, #tpu.memory_space<smem>>, %arg3: memref<4xf32, #tpu.memory_space<smem>>) -> (i32, i32) {
    %c0_i32 = arith.constant 0 : i32
    %c0_i32_0 = arith.constant 0 : i32
    %c0_i32_1 = arith.constant 0 : i32
    return %c0_i32, %c0_i32_0 : i32, i32
  }
  func.func @transform_3(%arg0: i32, %arg1: i32, %arg2: memref<6xf32, #tpu.memory_space<smem>>, %arg3: memref<4xf32, #tpu.memory_space<smem>>) -> (i32, i32) {
    %c0_i32 = arith.constant 0 : i32
    %c0_i32_0 = arith.constant 0 : i32
    %c0_i32_1 = arith.constant 0 : i32
    return %c0_i32, %c0_i32_0 : i32, i32
  }
  func.func @transform_4(%arg0: i32, %arg1: i32, %arg2: memref<6xf32, #tpu.memory_space<smem>>, %arg3: memref<4xf32, #tpu.memory_space<smem>>) -> (i32, i32) {
    %c0_i32 = arith.constant 0 : i32
    %c0_i32_0 = arith.constant 0 : i32
    %c0_i32_1 = arith.constant 0 : i32
    return %c0_i32, %c0_i32_0 : i32, i32
  }
  func.func @transform_5(%arg0: i32, %arg1: i32, %arg2: memref<6xf32, #tpu.memory_space<smem>>, %arg3: memref<4xf32, #tpu.memory_space<smem>>) -> (i32, i32) {
    %c0_i32 = arith.constant 0 : i32
    %c0_i32_0 = arith.constant 0 : i32
    %c0_i32_1 = arith.constant 0 : i32
    return %c0_i32, %c0_i32_0 : i32, i32
  }
  func.func @transform_6(%arg0: i32, %arg1: i32, %arg2: memref<6xf32, #tpu.memory_space<smem>>, %arg3: memref<4xf32, #tpu.memory_space<smem>>) -> (i32, i32) {
    %c0_i32 = arith.constant 0 : i32
    %c0_i32_0 = arith.constant 0 : i32
    return %c0_i32, %arg0 : i32, i32
  }
  func.func @transform_7(%arg0: i32, %arg1: i32, %arg2: memref<6xf32, #tpu.memory_space<smem>>, %arg3: memref<4xf32, #tpu.memory_space<smem>>) -> (i32, i32) {
    %c0_i32 = arith.constant 0 : i32
    %c0_i32_0 = arith.constant 0 : i32
    return %c0_i32, %arg0 : i32, i32
  }
}

</mosaic_0001>

<bundles_post_ra>
// kernel: metalearner_forward.1
= control target key start
LH: loop header
LB: loop body
LE: loop exit
PB: predicated region body
PF: predicated region fallthrough
CT: control target
= control target key end

     0   :  { %s1741_s15 = smov [#allocation8]   ;;  %s1742_s16 = smov [#allocation9]   ;;  %s2537_s0 = inlined_call_operand.vmem [shape: f32[6], index: 0, kind: input, shape index: {}]   ;;  %s2538_s2 = inlined_call_operand.vmem [shape: f32[4,1,256], index: 2, kind: input, shape index: {}]   ;;  %s2539_s3 = inlined_call_operand.vmem [shape: f32[1,256], index: 3, kind: input, shape index: {}]   ;;  %s2540_s4 = inlined_call_operand.vmem [shape: f32[128,2], index: 4, kind: input, shape index: {}]   ;;  %s2541_s5 = inlined_call_operand.vmem [shape: f32[128,32], index: 5, kind: input, shape index: {}]   ;;  %s2542_s6 = inlined_call_operand.vmem [shape: f32[128,1], index: 6, kind: input, shape index: {}]   ;;  %s2543_s7 = inlined_call_operand.vmem [shape: f32[2,32], index: 7, kind: input, shape index: {}]   ;;  %s2544_s8 = inlined_call_operand.hbm [shape: f32[32,256], index: 8, kind: output, shape index: {0}]   ;;  %s2545_s9 = inlined_call_operand.hbm [shape: f32[1,256], index: 9, kind: output, shape index: {1}]   ;;  %s2546_s1 = inlined_call_operand.vmem [shape: f32[4], index: 1, kind: input, shape index: {}]  }
   0x1   :  { %2551 = sst [smem:[#allocation21_spill]] %s2538_s2  ;;  %s16_s11 = sshll.u32 %s2537_s0, 4  ;;  %s17_s11 = int_to_ptr.vmem [resolvable:$true] %s16_s11 }
   0x2   :  { %2552 = sst [smem:[#allocation22_spill]] %s2539_s3  ;;  %s21_s14 = sshll.u32 %s2546_s1, 4  ;;  %s22_s14 = int_to_ptr.vmem [resolvable:$true] %s21_s14 }
   0x3   :  { %2553 = sst [smem:[#allocation23_spill]] %s2540_s4 }
   0x4   :  { %19 = dma.vmem_to_smem %s17_s11, 16, %s1741_s15, [#allocation7] }
   0x5   :  { %24 = dma.vmem_to_smem %s22_s14, 16, %s1742_s16, [#allocation7] }
   0x6   :  { %1699 = dma.done.wait [#allocation7], 32 }
   0x7   :  { %1700 = vsyncadd [#allocation7], 4294967264 }
   0x8   :  { %27 = sfence }
   0x9   :  { %28 = vsyncpa [#allocation11], 0 }
   0xa   :  { %30 = vsyncpa [#allocation11 + $0x1], 0 }
   0xb   :  { %31 = vsyncpa [#allocation13], 0 }
   0xc   :  { %33 = vsyncpa [#allocation13 + $0x1], 0  ;;  %s1805_s17 = smov 0   ;;  %s1807_s0 = smov 0  }
   0xd   :  { %s1809_s18 = smov 0   ;;  %s1811_s1 = smov 0  }
   0xe   :  { %s1813_s19 = smov 0   ;;  %s1815_s20 = smov 0  }
   0xf   :  { %s1817_s21 = smov 0   ;;  %s1819_s22 = smov 0  }
  0x10 LB: > { %2554 = sst [smem:[#allocation17_spill]] %s1731_s20  ;;  %s1348_s23 = sadd.s32 4294967295, %s1739_s22   ;;  %s1739_s22 = sphi %s1819_s22, %s39_s22   ;;  %s1735_s21 = sphi %s1817_s21, %s2592_s21   ;;  %s1731_s20 = sphi %s1815_s20, %s2591_s20   ;;  %s1727_s19 = sphi %s1813_s19, %s2590_s19   ;;  %s1723_s1 = sphi %s1811_s1, %s2589_s1   ;;  %s1719_s18 = sphi %s1809_s18, %s2595_s18   ;;  %s1715_s0 = sphi %s1807_s0, %s2594_s0   ;;  %s1711_s17 = sphi %s1805_s17, %s2593_s17  }
  0x11   : > { %2555 = sst [smem:[#allocation18_spill]] %s1735_s21  ;;  %s1349_s24 = sadd.s32 4294967294, %s1739_s22  }
  0x12   : > { %s48_s25 = sadd.s32 1, %s1731_s20  ;;  %s51_s26 = sadd.s32 1, %s1735_s21 }
  0x13   : > { %p49_p0 = scmp.ge.s32.totalorder %s48_s25, 4  ;;  %p206_p1 = scmp.ne.s32.totalorder %s1719_s18, %s1715_s0 }
  0x14   : > { %p207_p2 = scmp.eq.s32.totalorder %s1348_s23, 7  ;;  %p212_p4 = scmp.ne.s32.totalorder %s1715_s0, %s1711_s17 }
  0x15   : > { %s2597_s25 = smov (%p49_p0, %s48_s25), 0  ;;  %s2599_s26 = smov (!%p49_p0, %s51_s26), %s1735_s21 }
  0x16   : > { %2556 = sst [smem:[#allocation19_spill]] %s2597_s25  ;;  %p1854_p3 = por %p207_p2, %p206_p1 }
  0x17   : > { %p53_p5 = scmp.ge.s32.totalorder %s2599_s26, 2  ;;  %p213_p6 = scmp.eq.s32.totalorder %s1349_s24, 7 }
  0x18   : > { %p1352_p7 = scmp.ge.s32.totalorder %s1739_s22, 1  ;;  %p285_p8 = scmp.lt.s32.totalorder %s1739_s22, 9 }
  0x19   : > { %s2601_s26 = smov (%p53_p5, %s2599_s26), 0  ;;  %p1864_p9 = por %p213_p6, %p212_p4 }
  0x1a   : > { %2558 = sst [smem:[#allocation20_spill]] %s2601_s26  ;;  %p286_p10 = pnand %p1352_p7, %p285_p8 }
  0x1b   : > { %s193_s29 = ssub.s32 %s1735_s21, %s2601_s26  ;;  %s196_s30 = sadd.s32 1, %s1719_s18 }
  0x1c   : > { %p194_p11 = scmp.eq.s32.totalorder %s193_s29, 0  ;;  %289 = sbr.rel (%p286_p10) target bundleno = 551 (0x227), region = 44 }
  0x1d   : > { %s1875_s11 = sand.u32 (!%p286_p10), 1, %s1715_s0   ;;  %p326_p12 = scmp.lt.s32.totalorder (!%p286_p10), %s1723_s1, 3 }
  0x1e   : > { %s1872_s10 = scalar_select %p194_p11, %s1719_s18, %s196_s30  }
  0x1f   : > { %s1353_s12 = sshll.u32 (!%p286_p10), %s1875_s11, 5  ;;  %p328_p13 = scmp.lt.s32.totalorder (!%p286_p10), %s1727_s19, 1 }
  0x20   : > { %s2560_s3 = sld [smem:[#allocation22_spill]] (!%p286_p10)  ;;  %s1891_s21 = scalar_lea.vmem (!%p286_p10), [#allocation10], %s1353_s12 }
  0x21   : > { %s327_s13 = scalar_select %p326_p12, %s1723_s1, 3 }
  0x22   : > { %s329_s14 = scalar_select %p328_p13, %s1727_s19, 1 }
  0x23   : > { %s1354_s15 = sshll.u32 %s327_s13, 1  ;;  %s2561_s2 = sld [smem:[#allocation21_spill]] }
  0x24   : > { %s1882_s16 = sadd.s32 %s1354_s15, %s329_s14  ;;  %s2550_s20 = scalar_lea.vmem [#allocation12], %s1875_s11 }
  0x25   : > { %p1355_p0 = scmp.ne.s32.totalorder %s1723_s1, 0 }
  0x26   : > { %s335_s29 = scalar_lea.vmem %s2560_s3, %s329_s14 }
  0x27   : > { %339 = sbr.rel (%p1355_p0) target bundleno = 56 (0x38), region = 48 }
  0x29   : > { %s332_s25 = scalar_lea.vmem %s2561_s2, %s1882_s16 }
  0x2c   : > { %v1743_v0 = vmov 0.0   ;;  %v350_v1 = vld [vmem:[%s335_s29] sm:$0x1] }
  0x2d   : > { %340 = vst [vmem:[#allocation2 + $0x10] sm:$0xff] %v1743_v0 }
  0x2e   : > { %341 = vst [vmem:[#allocation2] sm:$0xff] %v1743_v0 }
  0x2f   : > { %342 = vst [vmem:[#allocation2 + $0x18] sm:$0xff] %v1743_v0 }
  0x30   : > { %343 = vst [vmem:[#allocation2 + $0x8] sm:$0xff] %v1743_v0 }
  0x31   : > { %344 = vst [vmem:[#allocation3] sm:$0xff] %v1743_v0 }
  0x32   : > { %345 = vst [vmem:[#allocation3 + $0x18] sm:$0xff] %v1743_v0 }
  0x33   : > { %346 = vst [vmem:[#allocation3 + $0x8] sm:$0xff] %v1743_v0 }
  0x34   : > { %347 = vst [vmem:[#allocation3 + $0x10] sm:$0xff] %v1743_v0 }
  0x35   : > { %348 = vst [vmem:[#allocation4] sm:$0x1] %v1743_v0 }
  0x36   : > { %349 = vst [vmem:[#allocation5] sm:$0x1] %v1743_v0 }
  0x37   : > { %351 = vst [vmem:[#allocation6] sm:$0x1] %v350_v1 }
  0x38 PF: > { %v357_v2 = vld [vmem:[#allocation2 + $0x8] sm:$0xff]  ;;  %s2562_s4 = sld [smem:[#allocation23_spill]]  ;;  %v1744_v4 = vmov 0   ;;  %v356_v6 = vld [vmem:[#allocation2 + $0x18] sm:$0xff]  ;;  %v355_v7 = vld [vmem:[#allocation2] sm:$0xff]  ;;  %v1745_v11 = vmov 1  }
  0x39   : > { %s353_s13 = sld [smem:[#allocation9 + %s1723_s1]]  ;;  %1494 = vset.pattern.permute.xlu2 %v1744_v4  ;;  %1493 = vset.pattern.permute.xlu1 %v1744_v4  ;;  %v354_v9 = vld [vmem:[#allocation2 + $0x10] sm:$0xff]  ;;  %v362_v12 = vld [vmem:[%s2541_s5] sm:$0xff]  ;;  %vm493_vm0 = vcmask 261120   ;;  %v363_v18 = vld [vmem:[%s2541_s5 + $0x8] sm:$0xff]  ;;  %p1392_p1 = scmp.ne.s32.totalorder %s1723_s1, 3 }
  0x3a   : > { %554 = vmatpush.msra.mxu0 %v357_v2  ;;  %1397 = vmatpush.msra.mxu1 %v357_v2  ;;  %v366_v13 = vld [vmem:[%s2541_s5 + $0x20] sm:$0xff]  ;;  %v368_v15 = vld [vmem:[%s2541_s5 + $0x30] sm:$0xff]  ;;  %v367_v19 = vld [vmem:[%s2541_s5 + $0x28] sm:$0xff]  ;;  %s1387_s26 = sld [smem:[#allocation8 + $0x3]] }
  0x3b   : > { %1398 = vmatpush.msra.mxu2 %v357_v2  ;;  %1496 = vset.pattern.permute.xlu0 %v1745_v11  ;;  %v369_v21 = vld [vmem:[%s2541_s5 + $0x38] sm:$0xff]  ;;  %v364_v27 = vld [vmem:[%s2541_s5 + $0x10] sm:$0xff]  ;;  %v374_v31 = vld [vmem:[%s2541_s5 + $0x60] sm:$0xff]  ;;  %s1388_s12 = sld [smem:[#allocation8 + $0x4]] }
  0x3c   : > { %555 = vmatpush.msra.mxu0 %v356_v6  ;;  %1400 = vmatpush.msra.mxu1 %v356_v6  ;;  %v373_v24 = vld [vmem:[%s2541_s5 + $0x58] sm:$0xff]  ;;  %v375_v37 = vld [vmem:[%s2541_s5 + $0x68] sm:$0xff]  ;;  %v370_v38 = vld [vmem:[%s2541_s5 + $0x40] sm:$0xff]  ;;  %s1385_s14 = sld [smem:[#allocation8 + $0x1]] }
  0x3d   : > { %1401 = vmatpush.msra.mxu2 %v356_v6  ;;  %1399 = vmatpush.msra.mxu3 %v357_v2  ;;  %v365_v33 = vld [vmem:[%s2541_s5 + $0x18] sm:$0xff]  ;;  %v722_v41 = vld [vmem:[%s2542_s6 + $0x10] sm:$0xff]  ;;  %v371_v43 = vld [vmem:[%s2541_s5 + $0x48] sm:$0xff]  ;;  %s1386_s15 = sld [smem:[#allocation8 + $0x2]] }
  0x3e   : > { %v1898_v3 = vld [vmem:[%s2562_s4 + $0x20] sm:$0xff]  ;;  %v380_v5 = vld [vmem:[%s2562_s4 + $0x10] sm:$0xff]  ;;  %v385_v8 = vld [vmem:[%s2562_s4 + $0x38] sm:$0xff]  ;;  %556 = vmatpush.msra.mxu0 %v355_v7  ;;  %1403 = vmatpush.msra.mxu1 %v355_v7  ;;  %s1389_s23 = sld [smem:[#allocation8 + $0x5]] }
  0x3f   : > { %416 = vperm.xlu2 %1494, %v1898_v3   ;;  %406 = vperm.xlu1 %1493, %v380_v5   ;;  %v1910_v10 = vstv %s353_s13  ;;  %v381_v16 = vld [vmem:[%s2562_s4 + $0x18] sm:$0xff]  ;;  %v379_v17 = vld [vmem:[%s2562_s4 + $0x8] sm:$0xff]  ;;  %v384_v26 = vld [vmem:[%s2562_s4 + $0x30] sm:$0xff]  ;;  %s1119_s13 = sld [smem:[#allocation8]] }
  0x40   : > { %1404 = vmatpush.msra.mxu2 %v355_v7  ;;  %v615_v14 = vmul.f32 %v1910_v10, %v385_v8  ;;  %557 = vmatpush.msra.mxu0 %v354_v9  ;;  %v609_v20 = vmul.f32 %v1910_v10, %v379_v17  ;;  %v611_v22 = vmul.f32 %v1910_v10, %v381_v16  ;;  %v383_v23 = vld [vmem:[%s2562_s4 + $0x28] sm:$0xff]  ;;  %v1977_v32 = vld [vmem:[%s2562_s4 + $0x50] sm:$0xff]  ;;  %v727_v35 = vld [vmem:[%s2542_s6 + $0x38] sm:$0xff] }
  0x41   : > { %1406 = vmatpush.msra.mxu1 %v354_v9  ;;  %1356 = vmatmul.msk.f32.vlgmr.msra.gmra.mxu0 %vm493_vm0, %v362_v12  ;;  %v1956_v25 = vld [vmem:[%s2562_s4 + $0x68] sm:$0xff]  ;;  %v610_v29 = vmul.f32 %v1910_v10, %v380_v5  ;;  %v614_v30 = vmul.f32 %v1910_v10, %v384_v26  ;;  %v618_v34 = vmul.f32 %v1910_v10, %v1977_v32  ;;  %v723_v36 = vld [vmem:[%s2542_s6 + $0x18] sm:$0xff]  ;;  %v378_v39 = vld [vmem:[%s2562_s4] sm:$0xff] }
  0x42   : > { %1407 = vmatpush.msra.mxu2 %v354_v9  ;;  %1360 = vmatmul.msk.f32.vlgmr.msra.gmra.mxu1 %vm493_vm0, %v366_v13  ;;  %v621_v28 = vmul.f32 %v1910_v10, %v1956_v25  ;;  %v613_v40 = vmul.f32 %v1910_v10, %v383_v23  ;;  %v376_v42 = vld [vmem:[%s2541_s5 + $0x70] sm:$0xff]  ;;  %v612_v44 = vmul.f32 %v1910_v10, %v1898_v3  ;;  %v377_v46 = vld [vmem:[%s2541_s5 + $0x78] sm:$0xff]  ;;  %v725_v48 = vld [vmem:[%s2542_s6 + $0x28] sm:$0xff] }
  0x43   : > { %1362 = vmatmul.msk.f32.vlgmr.msra.gmra.mxu2 %vm493_vm0, %v368_v15  ;;  %661 = vperm.xlu0 %1496, %v615_v14   ;;  %v608_v45 = vmul.f32 %v1910_v10, %v378_v39  ;;  %v372_v47 = vld [vmem:[%s2541_s5 + $0x50] sm:$0xff]  ;;  %v721_v49 = vld [vmem:[%s2542_s6 + $0x8] sm:$0xff]  ;;  %v724_v51 = vld [vmem:[%s2542_s6 + $0x20] sm:$0xff] }
  0x44   : > { %1402 = vmatpush.msra.mxu3 %v356_v6  ;;  %v726_v50 = vld [vmem:[%s2542_s6 + $0x30] sm:$0xff]  ;;  %v720_v52 = vld [vmem:[%s2542_s6] sm:$0xff]  ;;  %v393_v53 = vld [vmem:[%s2562_s4 + $0x78] sm:$0xff] }
  0x45   : > { %v623_v54 = vmul.f32 %v1910_v10, %v393_v53  ;;  %v392_v55 = vld [vmem:[%s2562_s4 + $0x70] sm:$0xff]  ;;  %v735_v57 = vld [vmem:[%s2542_s6 + $0x78] sm:$0xff]  ;;  %v390_v58 = vld [vmem:[%s2562_s4 + $0x60] sm:$0xff] }
  0x46   : > { %1405 = vmatpush.msra.mxu3 %v355_v7  ;;  %v622_v56 = vmul.f32 %v1910_v10, %v392_v55  ;;  %v389_v60 = vld [vmem:[%s2562_s4 + $0x58] sm:$0xff]  ;;  %v734_v61 = vld [vmem:[%s2542_s6 + $0x70] sm:$0xff]  ;;  %v620_v63 = vmul.f32 %v1910_v10, %v390_v58  ;;  %v733_v0 = vld [vmem:[%s2542_s6 + $0x68] sm:$0xff] }
  0x47   : > { %431 = vperm.xlu2 %1494, %v385_v8   ;;  %411 = vperm.xlu1 %1493, %v381_v16   ;;  %v729_v1 = vld [vmem:[%s2542_s6 + $0x48] sm:$0xff]  ;;  %v732_v5 = vld [vmem:[%s2542_s6 + $0x60] sm:$0xff]  ;;  %v731_v16 = vld [vmem:[%s2542_s6 + $0x58] sm:$0xff] }
  0x48   : > { %1408 = vmatpush.msra.mxu3 %v354_v9  ;;  %v387_v3 = vld [vmem:[%s2562_s4 + $0x48] sm:$0xff]  ;;  %v386_v8 = vld [vmem:[%s2562_s4 + $0x40] sm:$0xff]  ;;  %v619_v9 = vmul.f32 %v1910_v10, %v389_v60 }
  0x49   : > { %1357 = vmatmul.msk.f32.gmra.mxu0 %vm493_vm0, %v363_v18  ;;  %1367 = vmatmul.msk.f32.vlgmr.msra.gmra.mxu3 %vm493_vm0, %v373_v24  ;;  %v617_v14 = vmul.f32 %v1910_v10, %v387_v3 }
  0x4a   : > { %1361 = vmatmul.msk.f32.gmra.mxu1 %vm493_vm0, %v367_v19  ;;  %v616_v19 = vmul.f32 %v1910_v10, %v386_v8 }
  0x4b   : > { %1363 = vmatmul.msk.f32.gmra.mxu2 %vm493_vm0, %v369_v21  ;;  %631 = vperm.xlu0 %1496, %v609_v20  }
  0x4f   : > { %1495 = vset.pattern.permute.xlu2 %v1745_v11  ;;  %421 = vperm.xlu1 %1493, %v383_v23  }
  0x50   : > { %641 = vperm.xlu2 %1495, %v611_v22   ;;  %v730_v22 = vld [vmem:[%s2542_s6 + $0x50] sm:$0xff] }
  0x51   : > { %1358 = vmatmul.msk.f32.gmra.mxu0 %vm493_vm0, %v364_v27  ;;  %1368 = vmatmul.msk.f32.gmra.mxu3 %vm493_vm0, %v374_v31 }
  0x53   : > { %691 = vperm.xlu0 %1496, %v621_v28   ;;  %1364 = vmatmul.msk.f32.gmra.mxu2 %vm493_vm0, %v370_v38 }
  0x57   : > { %1497 = vset.pattern.permute.xlu1 %v1745_v11 }
  0x58   : > { %656 = vperm.xlu2 %1495, %v614_v30   ;;  %636 = vperm.xlu1 %1497, %v610_v29   ;;  %v728_v30 = vld [vmem:[%s2542_s6 + $0x40] sm:$0xff] }
  0x59   : > { %1359 = vmatmul.msk.f32.gmra.mxu0 %vm493_vm0, %v365_v33  ;;  %1369 = vmatmul.msk.f32.gmra.mxu3 %vm493_vm0, %v375_v37 }
  0x5b   : > { %676 = vperm.xlu0 %1496, %v618_v34   ;;  %1365 = vmatmul.msk.f32.gmra.mxu2 %vm493_vm0, %v371_v43 }
  0x60   : > { %1499 = vset.pattern.permute.xlu2 %v1744_v4  ;;  %1498 = vset.pattern.permute.xlu1 %v1744_v4 }
  0x61   : > { %773 = vperm.xlu2 %1499, %v727_v35   ;;  %753 = vperm.xlu1 %1498, %v723_v36  }
  0x62   : > { %1370 = vmatmul.msk.f32.gmra.mxu3 %vm493_vm0, %v376_v42 }
  0x63   : > { %1511 = vset.pattern.permute.xlu0 %v1744_v4  ;;  %1366 = vmatmul.msk.f32.gmra.mxu2 %vm493_vm0, %v372_v47 }
  0x64   : > { %396 = vperm.xlu0 %1511, %v378_v39  }
  0x69   : > { %748 = vperm.xlu2 %1499, %v722_v41   ;;  %1500 = vset.pattern.permute.xlu1 %v1745_v11 }
  0x6a   : > { %651 = vperm.xlu1 %1500, %v613_v40   ;;  %1371 = vmatmul.msk.f32.gmra.mxu3 %vm493_vm0, %v377_v46 }
  0x6c   : > { %401 = vperm.xlu0 %1511, %v379_v17  }
  0x71   : > { %1501 = vset.pattern.permute.xlu2 %v1745_v11 }
  0x72   : > { %646 = vperm.xlu2 %1501, %v612_v44   ;;  %626 = vperm.xlu1 %1500, %v608_v45  }
  0x74   : > { %426 = vperm.xlu0 %1511, %v384_v26  }
  0x7a   : > { %1503 = vset.pattern.permute.xlu2 %v1744_v4  ;;  %1502 = vset.pattern.permute.xlu1 %v1744_v4 }
  0x7b   : > { %763 = vperm.xlu2 %1503, %v725_v48   ;;  %743 = vperm.xlu1 %1502, %v721_v49  }
  0x7c   : > { %768 = vperm.xlu0 %1511, %v726_v50  }
  0x83   : > { %758 = vperm.xlu2 %1503, %v724_v51   ;;  %738 = vperm.xlu1 %1502, %v720_v52  }
  0x84   : > { %471 = vperm.xlu0 %1511, %v393_v53  }
  0x8b   : > { %1504 = vset.pattern.permute.xlu2 %v1745_v11  ;;  %461 = vperm.xlu1 %1502, %v1956_v25  }
  0x8c   : > { %701 = vperm.xlu2 %1504, %v623_v54   ;;  %466 = vperm.xlu0 %1511, %v392_v55  }
  0x93   : > { %1505 = vset.pattern.permute.xlu1 %v1745_v11 }
  0x94   : > { %1506 = vset.pattern.permute.xlu2 %v1744_v4  ;;  %696 = vperm.xlu1 %1505, %v622_v56  }
  0x95   : > { %813 = vperm.xlu2 %1506, %v735_v57   ;;  %456 = vperm.xlu0 %1511, %v390_v58  }
  0x99   : > { %v417_v59 = vpop.permute.xlu2 %416 }
  0x9c   : > { %1507 = vset.pattern.permute.xlu1 %v1744_v4 }
  0x9d   : > { %451 = vperm.xlu2 %1506, %v389_v60   ;;  %808 = vperm.xlu1 %1507, %v734_v61  }
  0x9e   : > { %446 = vperm.xlu0 %1511, %v1977_v32  }
  0xa1   : > { %v432_v62 = vpop.permute.xlu2 %431 }
  0xa5   : > { %803 = vperm.xlu2 %1506, %v733_v0   ;;  %1508 = vset.pattern.permute.xlu1 %v1745_v11 }
  0xa6   : > { %686 = vperm.xlu1 %1508, %v620_v63   ;;  %783 = vperm.xlu0 %1511, %v729_v1  }
  0xaa   : > { %v642_v2 = vpop.permute.xlu2 %641 }
  0xad   : > { %441 = vperm.xlu2 %1506, %v387_v3  }
  0xae   : > { %1509 = vset.pattern.permute.xlu1 %v1744_v4 }
  0xaf   : > { %798 = vperm.xlu1 %1509, %v732_v5  }
  0xb1   : > { %v407_v6 = vpop.permute.xlu1 %406 }
  0xb2   : > { %v2089_v7 = vpop.permute.xlu2 %656 }
  0xb5   : > { %436 = vperm.xlu2 %1506, %v386_v8   ;;  %v662_v12 = vpop.permute.xlu0 %661 }
  0xb7   : > { %1510 = vset.pattern.permute.xlu1 %v1745_v11 }
  0xb8   : > { %681 = vperm.xlu1 %1510, %v619_v9  }
  0xb9   : > { %v412_v13 = vpop.permute.xlu1 %411 }
  0xbb   : > { %v774_v15 = vpop.permute.xlu2 %773 }
  0xbd   : > { %1513 = vset.pattern.permute.xlu2 %v1745_v11  ;;  %v632_v17 = vpop.permute.xlu0 %631  ;;  %v2111_v11 = vld [vmem:[%s332_s25] ss:$0 sm:$0xff] }
  0xbe   : > { %671 = vperm.xlu2 %1513, %v617_v14   ;;  %v559_v20 = vpop.f32.mrf.mxu0  ;;  %v481_v24 = vmul.f32 %v2111_v11, %v417_v59  ;;  %v484_v31 = vmul.f32 %v2111_v11, %v432_v62  ;;  %v479_v33 = vmul.f32 %v2111_v11, %v407_v6  ;;  %v480_v44 = vmul.f32 %v2111_v11, %v412_v13 }
  0xbf   : > { %v571_v23 = vpop.f32.mrf.mxu1 }
  0xc0   : > { %1512 = vset.pattern.permute.xlu1 %v1744_v4  ;;  %v572_v26 = vadd.f32 %v571_v23, %v481_v24 }
  0xc1   : > { %v422_v18 = vpop.permute.xlu1 %421  ;;  %793 = vperm.xlu1 %1512, %v731_v16  }
  0xc2   : > { %v482_v62 = vmul.f32 %v2111_v11, %v422_v18 }
  0xc3   : > { %v749_v21 = vpop.permute.xlu2 %748 }
  0xc5   : > { %v2113_v4 = vpop.permute.xlu0 %691 }
  0xc6   : > { %666 = vperm.xlu2 %1513, %v616_v19   ;;  %v2116_v25 = vpop.f32.mrf.mxu2  ;;  %v562_v10 = vpop.f32.mrf.mxu0 }
  0xc7   : > { %v574_v60 = vpop.f32.mrf.mxu1 }
  0xc8   : > { %v575_v0 = vadd.f32 %v574_v60, %v482_v62 }
  0xc9   : > { %788 = vperm.xlu1 %1512, %v730_v22  }
  0xca   : > { %v637_v27 = vpop.permute.xlu1 %636 }
  0xcc   : > { %v647_v28 = vpop.permute.xlu2 %646  ;;  %v2131_v56 = vpop.f32.mrf.mxu3 }
  0xcd   : > { %v708_v29 = vadd.f32 %v647_v28, %v572_v26  ;;  %v2122_v32 = vpop.permute.xlu0 %676 }
  0xce   : > { %v580_v34 = vpop.f32.mrf.mxu2  ;;  %v565_v36 = vpop.f32.mrf.mxu0 }
  0xcf   : > { %v581_v35 = vadd.f32 %v580_v34, %v484_v31  ;;  %v566_v37 = vadd.f32 %v565_v36, %v479_v33 }
  0xd1   : > { %778 = vperm.xlu1 %1512, %v728_v30   ;;  %v711_v39 = vadd.f32 %v662_v12, %v581_v35  ;;  %v706_v40 = vadd.f32 %v637_v27, %v566_v37 }
  0xd3   : > { %v754_v38 = vpop.permute.xlu1 %753  ;;  %v823_v42 = vadd.f32 %v774_v15, %v711_v39  ;;  %v2125_v43 = vadd.f32 %v749_v21, %v706_v40 }
  0xd5   : > { %v764_v41 = vpop.permute.xlu2 %763  ;;  %v1379_v37 = vmul.f32 -1.442695, %v823_v42  ;;  %v1374_v62 = vmul.f32 -1.442695, %v2125_v43 }
  0xd6   : > { %v397_v45 = vpop.permute.xlu0 %396  ;;  %v568_v46 = vpop.f32.mrf.mxu0 }
  0xd7   : > { %v569_v47 = vadd.f32 %v568_v46, %v480_v44  ;;  %v477_v49 = vmul.f32 %v2111_v11, %v397_v45  ;;  %v2158_v45 = vpop.f32.mrf.mxu2 }
  0xd9   : > { %v707_v50 = vadd.f32 %v642_v2, %v569_v47  ;;  %v560_v55 = vadd.f32 %v559_v20, %v477_v49  ;;  %v2137_v2 = vpop.f32.mrf.mxu3 }
  0xdb   : > { %v819_v53 = vadd.f32 %v754_v38, %v707_v50 }
  0xdc   : > { %v652_v48 = vpop.permute.xlu1 %651 }
  0xdd   : > { %v759_v51 = vpop.permute.xlu2 %758  ;;  %v709_v3 = vadd.f32 %v652_v48, %v575_v0  ;;  %v1375_v38 = vmul.f32 -1.442695, %v819_v53 }
  0xde   : > { %v2129_v52 = vadd.f32 %v759_v51, %v708_v29  ;;  %v402_v54 = vpop.permute.xlu0 %401 }
  0xdf   : > { %v478_v61 = vmul.f32 %v2111_v11, %v402_v54  ;;  %v821_v9 = vadd.f32 %v764_v41, %v709_v3 }
  0xe1   : > { %v563_v1 = vadd.f32 %v562_v10, %v478_v61  ;;  %v1377_v14 = vmul.f32 -1.442695, %v821_v9  ;;  %v598_v16 = vpop.f32.mrf.mxu3  ;;  %v586_v9 = vpop.f32.mrf.mxu2 }
  0xe3   : > { %v705_v8 = vadd.f32 %v632_v17, %v563_v1  ;;  %1515 = vpow2.f32 %v1377_v14 }
  0xe4   : > { %v627_v57 = vpop.permute.xlu1 %626 }
  0xe5   : > { %v2133_v58 = vadd.f32 %v627_v57, %v560_v55 }
  0xe6   : > { %v702_v59 = vpop.permute.xlu2 %701  ;;  %v427_v63 = vpop.permute.xlu0 %426 }
  0xe7   : > { %v483_v33 = vmul.f32 %v2111_v11, %v427_v63 }
  0xe9   : > { %v1516_v23 = vpop.eup %1515  ;;  %v601_v17 = vpop.f32.mrf.mxu3 }
  0xea   : > { %v2146_v28 = vadd.f32 1.0, %v1516_v23  ;;  %v1376_v23 = vmul.f32 -1.442695, %v2129_v52 }
  0xec   : > { %vm944_vm2 = vweird.f32 %v2146_v28 }
  0xed   : > { %v744_v5 = vpop.permute.xlu1 %743 }
  0xee   : > { %v769_v12 = vpop.permute.xlu0 %768  ;;  %v817_v13 = vadd.f32 %v744_v5, %v705_v8 }
  0xef   : > { %v2139_v6 = vpop.permute.xlu2 %813 }
  0xf0   : > { %v1373_v19 = vmul.f32 -1.442695, %v817_v13 }
  0xf1   : > { %v604_v41 = vpop.f32.mrf.mxu3 }
  0xf2   : > { %1517 = vpow2.f32 %v1373_v19 }
  0xf3   : > { %1519 = vrcp.f32 %v2146_v28 }
  0xf5   : > { %v2141_v15 = vpop.permute.xlu1 %738 }
  0xf6   : > { %v472_v18 = vpop.permute.xlu0 %471 }
  0xf7   : > { %v2143_v20 = vpop.permute.xlu2 %451  ;;  %v492_v39 = vmul.f32 %v2111_v11, %v472_v18 }
  0xf8   : > { %v1518_v10 = vpop.eup %1517 }
  0xf9   : > { %v2149_v30 = vadd.f32 1.0, %v1518_v10  ;;  %v2156_v44 = vpop.eup %1519  ;;  %v605_v47 = vadd.f32 %v604_v41, %v492_v39 }
  0xfa   : > { %v940_v49 = vmul.f32 %v2156_v44, %v2146_v28  ;;  %vm945_vm1 = vweird.f32 %v2156_v44 }
  0xfb   : > { %1521 = vrcp.f32 %v2149_v30  ;;  %v719_v55 = vadd.f32 %v702_v59, %v605_v47  ;;  %vm2202_vm4 = vmor %vm944_vm2, %vm945_vm1  ;;  %vm868_vm5 = vweird.f32 %v2149_v30  ;;  %v872_v39 = vand.u32 2147483647, %v2149_v30 }
  0xfd   : > { %v462_v21 = vpop.permute.xlu1 %461  ;;  %v831_v8 = vadd.f32 %v2139_v6, %v719_v55  ;;  %vm873_vm8 = vcmp.eq.f32.partialorder %v872_v39, 8.507059e+37 }
  0xfe   : > { %v490_v22 = vmul.f32 %v2111_v11, %v462_v21  ;;  %v467_v27 = vpop.permute.xlu0 %466 }
  0xff   : > { %v804_v24 = vpop.permute.xlu2 %803  ;;  %v491_v1 = vmul.f32 %v2111_v11, %v467_v27  ;;  %v1383_v18 = vmul.f32 -1.442695, %v831_v8 }
 0x100   : > { %v599_v26 = vadd.f32 %v598_v16, %v490_v22 }
 0x101   : > { %v2160_v46 = vpop.eup %1521  ;;  %v602_v13 = vadd.f32 %v601_v17, %v491_v1 }
 0x102   : > { %v717_v29 = vadd.f32 %v2113_v4, %v599_v26  ;;  %v578_v4 = vadd.f32 %v2116_v25, %v483_v33  ;;  %v864_v54 = vmul.f32 %v2160_v46, %v2149_v30  ;;  %v950_v26 = vand.u32 2147483648, %v2146_v28 }
 0x103   : > { %vm869_vm3 = vweird.f32 %v2160_v46 }
 0x104   : > { %v829_v31 = vadd.f32 %v804_v24, %v717_v29  ;;  %v710_v42 = vadd.f32 %v2089_v7, %v578_v4  ;;  %v941_v7 = vsub.f32 1.0, %v940_v49  ;;  %v865_v5 = vsub.f32 1.0, %v864_v54  ;;  %vm2219_vm6 = vmor %vm868_vm5, %vm869_vm3 }
 0x105   : > { %v816_v24 = vadd.f32 %v2141_v15, %v2133_v58  ;;  %v948_v58 = vand.u32 2147483647, %v2146_v28  ;;  %v951_v47 = vor.u32 1.1754944e-38, %v950_v26 }
 0x106   : > { %v1381_v34 = vmul.f32 -1.442695, %v829_v31  ;;  %v697_v35 = vpop.permute.xlu1 %696  ;;  %v822_v53 = vadd.f32 %v769_v12, %v710_v42  ;;  %v942_v12 = vmul.f32 %v2156_v44, %v941_v7  ;;  %v866_v6 = vmul.f32 %v2160_v46, %v865_v5 }
 0x107   : > { %v442_v36 = vpop.permute.xlu2 %441  ;;  %v457_v40 = vpop.permute.xlu0 %456  ;;  %v718_v27 = vadd.f32 %v697_v35, %v602_v13  ;;  %vm949_vm7 = vcmp.eq.f32.partialorder %v948_v58, 8.507059e+37 }
 0x108   : > { %1523 = vpow2.f32 %v1381_v34  ;;  %v486_v63 = vmul.f32 %v2111_v11, %v442_v36  ;;  %v1378_v0 = vmul.f32 -1.442695, %v822_v53  ;;  %v943_v17 = vadd.f32 %v2156_v44, %v942_v12  ;;  %v359_v53 = vld [vmem:[#allocation3 + $0x18] sm:$0xff] }
 0x109   : > { %1525 = vpow2.f32 %v1379_v37  ;;  %v867_v52 = vadd.f32 %v2160_v46, %v866_v6  ;;  %v489_v33 = vmul.f32 %v2111_v11, %v457_v40  ;;  %v874_v36 = vand.u32 2147483648, %v2149_v30 }
 0x10a   : > { %1527 = vpow2.f32 %v1375_v38  ;;  %v587_v43 = vadd.f32 %v586_v9, %v486_v63  ;;  %v1372_v38 = vmul.f32 -1.442695, %v816_v24  ;;  %v947_v28 = vsel %vm2202_vm4, %v2156_v44, %v943_v17 }
 0x10b   : > { %v871_v30 = vsel %vm2219_vm6, %v2160_v46, %v867_v52  ;;  %v875_v54 = vor.u32 1.1754944e-38, %v874_v36  ;;  %v952_v55 = vsel %vm949_vm7, %v951_v47, %v947_v28 }
 0x10d   : > { %v876_v63 = vsel %vm873_vm8, %v875_v54, %v871_v30 }
 0x10e   : > { %v1524_v48 = vpop.eup %1523 }
 0x10f   : > { %v2165_v50 = vadd.f32 1.0, %v1524_v48  ;;  %v809_v51 = vpop.permute.xlu1 %808  ;;  %v2167_v25 = vpop.permute.xlu2 %436 }
 0x110   : > { %v2171_v57 = vpop.permute.xlu0 %446  ;;  %v1526_v60 = vpop.eup %1525  ;;  %v830_v34 = vadd.f32 %v809_v51, %v718_v27  ;;  %v596_v51 = vadd.f32 %v2137_v2, %v489_v33 }
 0x111   : > { %v1528_v61 = vpop.eup %1527  ;;  %1529 = vrcp.f32 %v2165_v50  ;;  %v2177_v3 = vadd.f32 1.0, %v1526_v60  ;;  %vm1024_vm10 = vweird.f32 %v2165_v50 }
 0x112   : > { %v2180_v59 = vadd.f32 1.0, %v1528_v61  ;;  %1531 = vpow2.f32 %v1374_v62  ;;  %v1382_v49 = vmul.f32 -1.442695, %v830_v34 }
 0x113   : > { %1533 = vpow2.f32 %v1378_v0  ;;  %v1065_v0 = vmul.f32 %v952_v55, %v359_v53  ;;  %vm974_vm14 = vweird.f32 %v2177_v3  ;;  %v980_v41 = vand.u32 2147483648, %v2177_v3  ;;  %v589_v53 = vpop.f32.mrf.mxu2 }
 0x114   : > { %1535 = vrcp.f32 %v2177_v3  ;;  %vm898_vm4 = vweird.f32 %v2180_v59 }
 0x115   : > { %1537 = vrcp.f32 %v2180_v59 }
 0x116   : > { %1539 = vpow2.f32 %v1383_v18  ;;  %v1030_v18 = vand.u32 2147483648, %v2165_v50 }
 0x117   : > { %v2183_v19 = vpop.eup %1529 }
 0x118   : > { %v672_v14 = vpop.permute.xlu2 %671  ;;  %v687_v16 = vpop.permute.xlu1 %686  ;;  %v1020_v29 = vmul.f32 %v2183_v19, %v2165_v50  ;;  %vm1025_vm9 = vweird.f32 %v2183_v19  ;;  %v1031_v58 = vor.u32 1.1754944e-38, %v1030_v18 }
 0x119   : > { %v713_v21 = vadd.f32 %v672_v14, %v587_v43  ;;  %v784_v22 = vpop.permute.xlu0 %783  ;;  %v1532_v31 = vpop.eup %1531  ;;  %v716_v7 = vadd.f32 %v687_v16, %v596_v51  ;;  %vm2251_vm11 = vmor %vm1024_vm10, %vm1025_vm9 }
 0x11a   : > { %v1534_v15 = vpop.eup %1533  ;;  %v2215_v4 = vadd.f32 1.0, %v1532_v31  ;;  %v1021_v48 = vsub.f32 1.0, %v1020_v29  ;;  %v488_v29 = vmul.f32 %v2111_v11, %v2143_v20 }
 0x11b   : > { %v825_v10 = vadd.f32 %v784_v22, %v713_v21  ;;  %v2206_v35 = vpop.eup %1535  ;;  %v2223_v42 = vadd.f32 1.0, %v1534_v15  ;;  %v978_v15 = vand.u32 2147483647, %v2177_v3 }
 0x11c   : > { %v2213_v40 = vpop.eup %1537  ;;  %v970_v61 = vmul.f32 %v2206_v35, %v2177_v3  ;;  %v1022_v46 = vmul.f32 %v2183_v19, %v1021_v48  ;;  %vm975_vm12 = vweird.f32 %v2206_v35  ;;  %v593_v37 = vadd.f32 %v2131_v56, %v488_v29 }
 0x11d   : > { %1541 = vtanh.f32 %v825_v10  ;;  %v1540_v60 = vpop.eup %1539  ;;  %v894_v43 = vmul.f32 %v2213_v40, %v2180_v59  ;;  %v487_v48 = vmul.f32 %v2111_v11, %v2171_v57  ;;  %vm2283_vm15 = vcmp.eq.f32.partialorder %v978_v15, 8.507059e+37  ;;  %vm2295_vm2 = vmor %vm974_vm14, %vm975_vm12 }
 0x11e   : > { %1543 = vpow2.f32 %v1376_v23  ;;  %v971_v8 = vsub.f32 1.0, %v970_v61  ;;  %v2234_v9 = vadd.f32 1.0, %v1540_v60  ;;  %v1023_v13 = vadd.f32 %v2183_v19, %v1022_v46 }
 0x11f   : > { %1545 = vpow2.f32 %v1372_v38  ;;  %v1028_v23 = vand.u32 2147483647, %v2165_v50  ;;  %v895_v31 = vsub.f32 1.0, %v894_v43  ;;  %v887_v56 = vand.u32 2147483647, %v2215_v4  ;;  %v361_v43 = vld [vmem:[#allocation3 + $0x10] sm:$0xff] }
 0x120   : > { %1547 = vrcp.f32 %v2215_v4  ;;  %v972_v10 = vmul.f32 %v2206_v35, %v971_v8  ;;  %v1027_v50 = vsel %vm2251_vm11, %v2183_v19, %v1023_v13  ;;  %vm899_vm1 = vweird.f32 %v2213_v40 }
 0x121   : > { %v799_v44 = vpop.permute.xlu1 %798  ;;  %1549 = vrcp.f32 %v2223_v42  ;;  %vm1029_vm13 = vcmp.eq.f32.partialorder %v1028_v23, 8.507059e+37  ;;  %v896_v38 = vmul.f32 %v2213_v40, %v895_v31  ;;  %v889_v54 = vand.u32 2147483648, %v2215_v4  ;;  %vm2320_vm5 = vmor %vm898_vm4, %vm899_vm1 }
 0x122   : > { %1551 = vpow2.f32 %v1382_v49  ;;  %v828_v5 = vadd.f32 %v799_v44, %v716_v7  ;;  %v973_v19 = vadd.f32 %v2206_v35, %v972_v10  ;;  %v1032_v36 = vsel %vm1029_vm13, %v1031_v58, %v1027_v50 }
 0x123   : > { %v1542_v62 = vpop.eup %1541  ;;  %v897_v61 = vadd.f32 %v2213_v40, %v896_v38  ;;  %vm883_vm3 = vweird.f32 %v2215_v4  ;;  %v904_v46 = vand.u32 2147483648, %v2180_v59  ;;  %v590_v8 = vadd.f32 %v589_v53, %v487_v48 }
 0x124   : > { %v1069_v2 = vmul.f32 %v1542_v62, %v876_v63  ;;  %v1544_v1 = vpop.eup %1543  ;;  %v1380_v22 = vmul.f32 -1.442695, %v828_v5  ;;  %v977_v62 = vsel %vm2295_vm2, %v2206_v35, %v973_v19  ;;  %v902_v63 = vand.u32 2147483647, %v2180_v59 }
 0x125   : > { %v1546_v14 = vpop.eup %1545  ;;  %v2240_v16 = vadd.f32 1.0, %v1544_v1  ;;  %v890_v18 = vor.u32 1.1754944e-38, %v889_v54  ;;  %v901_v59 = vsel %vm2320_vm5, %v2213_v40, %v897_v61  ;;  %v905_v17 = vor.u32 1.1754944e-38, %v904_v46  ;;  %v358_v40 = vld [vmem:[#allocation3] sm:$0xff] }
 0x126   : > { %v1073_v12 = vadd.f32 %v1069_v2, %v1065_v0  ;;  %v2243_v21 = vpop.eup %1547  ;;  %v2255_v27 = vadd.f32 1.0, %v1546_v14  ;;  %v981_v0 = vor.u32 1.1754944e-38, %v980_v41  ;;  %vm903_vm7 = vcmp.eq.f32.partialorder %v902_v63, 8.507059e+37 }
 0x127   : > { %v2247_v24 = vpop.eup %1549  ;;  %v879_v52 = vmul.f32 %v2243_v21, %v2215_v4  ;;  %vm884_vm6 = vweird.f32 %v2243_v21  ;;  %v965_v31 = vand.u32 2147483648, %v2223_v42  ;;  %vm2338_vm8 = vcmp.eq.f32.partialorder %v887_v56, 8.507059e+37  ;;  %v667_v56 = vpop.permute.xlu2 %666 }
 0x128   : > { %1089 = vst [vmem:[#allocation3 + $0x18] sm:$0xff] %v1073_v12  ;;  %1553 = vtanh.f32 %v1073_v12  ;;  %v1552_v26 = vpop.eup %1551  ;;  %v955_v20 = vmul.f32 %v2247_v24, %v2223_v42  ;;  %v982_v14 = vsel %vm2283_vm15, %v981_v0, %v977_v62  ;;  %vm960_vm9 = vweird.f32 %v2247_v24  ;;  %vm2356_vm12 = vmor %vm883_vm3, %vm884_vm6 }
 0x129   : > { %1555 = vrcp.f32 %v2234_v9  ;;  %v2269_v34 = vadd.f32 1.0, %v1552_v26  ;;  %v880_v47 = vsub.f32 1.0, %v879_v52  ;;  %v1067_v50 = vmul.f32 %v982_v14, %v361_v43 }
 0x12a   : > { %v682_v6 = vpop.permute.xlu1 %681  ;;  %1557 = vrcp.f32 %v2240_v16  ;;  %v956_v51 = vsub.f32 1.0, %v955_v20  ;;  %v714_v52 = vadd.f32 %v2122_v32, %v590_v8  ;;  %v906_v58 = vsel %vm903_vm7, %v905_v17, %v901_v59 }
 0x12b   : > { %1559 = vpow2.f32 %v1380_v22  ;;  %v715_v30 = vadd.f32 %v682_v6, %v593_v37  ;;  %v881_v2 = vmul.f32 %v2243_v21, %v880_v47  ;;  %v935_v22 = vand.u32 2147483648, %v2240_v16 }
 0x12c   : > { %1561 = vrcp.f32 %v2255_v27  ;;  %v957_v35 = vmul.f32 %v2247_v24, %v956_v51  ;;  %vm929_vm10 = vweird.f32 %v2240_v16  ;;  %v485_v19 = vmul.f32 %v2111_v11, %v2167_v25 }
 0x12d   : > { %1563 = vrcp.f32 %v2269_v34  ;;  %v882_v26 = vadd.f32 %v2243_v21, %v881_v2  ;;  %vm959_vm11 = vweird.f32 %v2223_v42  ;;  %v963_v25 = vand.u32 2147483647, %v2223_v42 }
 0x12e   : > { %v1554_v33 = vpop.eup %1553  ;;  %vm2365_vm14 = vmor %vm959_vm11, %vm960_vm9  ;;  %v966_v44 = vor.u32 1.1754944e-38, %v965_v31  ;;  %vm1054_vm15 = vweird.f32 %v2234_v9  ;;  %v584_v53 = vadd.f32 %v2158_v45, %v485_v19  ;;  %v1058_v45 = vand.u32 2147483647, %v2234_v9 }
 0x12f   : > { %v2275_v39 = vmul.f32 %v1554_v33, %v1032_v36  ;;  %v2277_v28 = vpop.eup %1555  ;;  %v958_v33 = vadd.f32 %v2247_v24, %v957_v35  ;;  %v886_v4 = vsel %vm2356_vm12, %v2243_v21, %v882_v26  ;;  %vm964_vm2 = vcmp.eq.f32.partialorder %v963_v25, 8.507059e+37 }
 0x130   : > { %v2289_v49 = vpop.eup %1557  ;;  %v1050_v7 = vmul.f32 %v2277_v28, %v2234_v9  ;;  %vm1055_vm1 = vweird.f32 %v2277_v28  ;;  %v891_v63 = vsel %vm2338_vm8, %v890_v18, %v886_v4  ;;  %v933_v0 = vand.u32 2147483647, %v2240_v16 }
 0x131   : > { %1085 = vst [vmem:[#allocation2] sm:$0xff] %v2275_v39  ;;  %v1560_v55 = vpop.eup %1559  ;;  %v925_v5 = vmul.f32 %v2289_v49, %v2240_v16  ;;  %vm930_vm13 = vweird.f32 %v2289_v49  ;;  %v962_v42 = vsel %vm2365_vm14, %v2247_v24, %v958_v33  ;;  %v360_v24 = vld [vmem:[#allocation3 + $0x8] sm:$0xff]  ;;  %vm2393_vm4 = vmor %vm1054_vm15, %vm1055_vm1  ;;  %vm1059_vm6 = vcmp.eq.f32.partialorder %v1058_v45, 8.507059e+37 }
 0x132   : > { %v2310_v1 = vpop.eup %1561  ;;  %v2316_v12 = vadd.f32 1.0, %v1560_v55  ;;  %v1051_v6 = vsub.f32 1.0, %v1050_v7  ;;  %v1060_v55 = vand.u32 2147483648, %v2234_v9  ;;  %v967_v61 = vsel %vm964_vm2, %v966_v44, %v962_v42  ;;  %vm2407_vm5 = vmor %vm929_vm10, %vm930_vm13 }
 0x133   : > { %v794_v3 = vpop.permute.xlu1 %793  ;;  %v2331_v23 = vpop.eup %1563  ;;  %v849_v10 = vmul.f32 %v2310_v1, %v2255_v27  ;;  %v926_v29 = vsub.f32 1.0, %v925_v5  ;;  %v936_v7 = vor.u32 1.1754944e-38, %v935_v22  ;;  %vm854_vm3 = vweird.f32 %v2310_v1 }
 0x134   : > { %v827_v60 = vadd.f32 %v794_v3, %v715_v30  ;;  %v1052_v32 = vmul.f32 %v2277_v28, %v1051_v6  ;;  %v1035_v37 = vmul.f32 %v2331_v23, %v2269_v34  ;;  %v1066_v14 = vmul.f32 %v967_v61, %v360_v24  ;;  %v1093_v24 = vld [vmem:[#allocation4] sm:$0x1] }
 0x135   : > { %v850_v38 = vsub.f32 1.0, %v849_v10  ;;  %v927_v48 = vmul.f32 %v2289_v49, %v926_v29  ;;  %v1061_v59 = vor.u32 1.1754944e-38, %v1060_v55  ;;  %vm853_vm7 = vweird.f32 %v2255_v27 }
 0x136   : > { %1565 = vtanh.f32 %v827_v60  ;;  %v1053_v3 = vadd.f32 %v2277_v28, %v1052_v32  ;;  %v1036_v57 = vsub.f32 1.0, %v1035_v37  ;;  %v712_v60 = vadd.f32 %v667_v56, %v584_v53  ;;  %vm2420_vm8 = vmor %vm853_vm7, %vm854_vm3  ;;  %v1095_v53 = vld [vmem:[%s2543_s7] sm:$0x3] }
 0x137   : > { %1567 = vrcp.f32 %v2316_v12  ;;  %v851_v21 = vmul.f32 %v2310_v1, %v850_v38  ;;  %v928_v62 = vadd.f32 %v2289_v49, %v927_v48  ;;  %v857_v16 = vand.u32 2147483647, %v2255_v27 }
 0x138   : > { %v1057_v35 = vsel %vm2393_vm4, %v2277_v28, %v1053_v3  ;;  %v1037_v43 = vmul.f32 %v2331_v23, %v1036_v57  ;;  %v859_v28 = vand.u32 2147483648, %v2255_v27  ;;  %vm1040_vm9 = vweird.f32 %v2331_v23  ;;  %v1094_v57 = vld [vmem:[#allocation5] sm:$0x1] }
 0x139   : > { %v852_v22 = vadd.f32 %v2310_v1, %v851_v21  ;;  %v932_v6 = vsel %vm2407_vm5, %v2289_v49, %v928_v62  ;;  %v1062_v26 = vsel %vm1059_vm6, %v1061_v59, %v1057_v35  ;;  %vm934_vm10 = vcmp.eq.f32.partialorder %v933_v0, 8.507059e+37 }
 0x13a   : > { %v1045_v27 = vand.u32 2147483648, %v2269_v34  ;;  %vm1039_vm11 = vweird.f32 %v2269_v34  ;;  %v1043_v33 = vand.u32 2147483647, %v2269_v34  ;;  %vm858_vm12 = vcmp.eq.f32.partialorder %v857_v16, 8.507059e+37 }
 0x13b   : > { %v789_v15 = vpop.permute.xlu1 %788  ;;  %vm1041_vm13 = vmor %vm1039_vm11, %vm1040_vm9  ;;  %v1015_v30 = vand.u32 2147483648, %v2316_v12  ;;  %vm1009_vm1 = vweird.f32 %v2316_v12  ;;  %v1152_v3 = vstv %s1387_s26  ;;  %v1125_v55 = vstv %s1119_s13 }
 0x13c   : > { %v1566_v20 = vpop.eup %1565  ;;  %v826_v36 = vadd.f32 %v789_v15, %v714_v52  ;;  %v856_v52 = vsel %vm2420_vm8, %v2310_v1, %v852_v22  ;;  %v937_v15 = vsel %vm934_vm10, %v936_v7, %v932_v6  ;;  %v1046_v38 = vor.u32 1.1754944e-38, %v1045_v27 }
 0x13d   : > { %v1071_v41 = vmul.f32 %v1566_v20, %v906_v58  ;;  %v2379_v54 = vpop.eup %1567  ;;  %v860_v58 = vor.u32 1.1754944e-38, %v859_v28  ;;  %v1064_v32 = vmul.f32 %v937_v15, %v358_v40  ;;  %vm1044_vm14 = vcmp.eq.f32.partialorder %v1043_v33, 8.507059e+37 }
 0x13e   : > { %1569 = vtanh.f32 %v826_v36  ;;  %v1005_v13 = vmul.f32 %v2379_v54, %v2316_v12  ;;  %vm1010_vm15 = vweird.f32 %v2379_v54  ;;  %v1016_v44 = vor.u32 1.1754944e-38, %v1015_v30 }
 0x13f   : > { %v1075_v51 = vadd.f32 %v1071_v41, %v1067_v50  ;;  %v1038_v50 = vadd.f32 %v2331_v23, %v1037_v43  ;;  %v861_v20 = vsel %vm858_vm12, %v860_v58, %v856_v52  ;;  %vm1011_vm2 = vmor %vm1009_vm1, %vm1010_vm15  ;;  %v1128_v61 = vstv %s1385_s14 }
 0x140   : > { %v1006_v49 = vsub.f32 1.0, %v1005_v13  ;;  %v1129_v7 = vmul.f32 %v1128_v61, %v1093_v24 }
 0x141   : > { %1091 = vst [vmem:[#allocation3 + $0x10] sm:$0xff] %v1075_v51  ;;  %1571 = vtanh.f32 %v1075_v51  ;;  %v1042_v19 = vsel %vm1041_vm13, %v2331_v23, %v1038_v50  ;;  %v1013_v23 = vand.u32 2147483647, %v2316_v12  ;;  %v2459_v12 = vld [vmem:[#allocation6] sm:$0x1] }
 0x142   : > { %v1007_v36 = vmul.f32 %v2379_v54, %v1006_v49  ;;  %v1047_v25 = vsel %vm1044_vm14, %v1046_v38, %v1042_v19  ;;  %v1153_v21 = vmul.f32 %v1152_v3, %v2459_v12  ;;  %v1126_v62 = vmul.f32 %v1125_v55, %v2459_v12 }
 0x143   : > { %v779_v46 = vpop.permute.xlu1 %778  ;;  %vm1014_vm3 = vcmp.eq.f32.partialorder %v1013_v23, 8.507059e+37 }
 0x144   : > { %v1570_v5 = vpop.eup %1569  ;;  %v824_v8 = vadd.f32 %v779_v46, %v712_v60  ;;  %v1008_v34 = vadd.f32 %v2379_v54, %v1007_v36  ;;  %v1155_v45 = vperm.slane %v1153_v21, 0 }
 0x145   : > { %v1070_v18 = vmul.f32 %v1570_v5, %v891_v63  ;;  %v1131_v5 = vstv %s1386_s15 }
 0x146   : > { %1573 = vtanh.f32 %v824_v8  ;;  %v1012_v4 = vsel %vm1011_vm2, %v2379_v54, %v1008_v34  ;;  %v1158_v54 = vstv %s1388_s12  ;;  %v1164_v8 = vstv %s1389_s23 }
 0x147   : > { %v1572_v10 = vpop.eup %1571  ;;  %v1074_v17 = vadd.f32 %v1070_v18, %v1066_v14  ;;  %v1017_v51 = vsel %vm1014_vm3, %v1016_v44, %v1012_v4  ;;  %v1159_v60 = vmul.f32 %v1158_v54, %v1094_v57 }
 0x148   : > { %v2424_v31 = vmul.f32 %v1572_v10, %v1062_v26 }
 0x149   : > { %1090 = vst [vmem:[#allocation3 + $0x8] sm:$0xff] %v1074_v17  ;;  %1575 = vtanh.f32 %v1074_v17  ;;  %v1161_v63 = vperm.slane %v1159_v60, 0 }
 0x14a   : > { %1087 = vst [vmem:[#allocation2 + $0x8] sm:$0xff] %v2424_v31  ;;  %1111 = vmatpush.msrb.mxu1 %v2424_v31 }
 0x14c   : > { %v1574_v1 = vpop.eup %1573 }
 0x14d   : > { %v1068_v37 = vmul.f32 %v1574_v1, %v861_v20 }
 0x14f   : > { %v1576_v41 = vpop.eup %1575  ;;  %v1072_v47 = vadd.f32 %v1068_v37, %v1064_v32 }
 0x150   : > { %v2440_v48 = vmul.f32 %v1576_v41, %v1047_v25 }
 0x151   : > { %1088 = vst [vmem:[#allocation3] sm:$0xff] %v1072_v47  ;;  %1577 = vtanh.f32 %v1072_v47 }
 0x152   : > { %1086 = vst [vmem:[#allocation2 + $0x18] sm:$0xff] %v2440_v48  ;;  %1112 = vmatpush.msrb.mxu1 %v2440_v48 }
 0x154   : > { %1113 = vmatpush.msrb.mxu1 %v2275_v39 }
 0x157   : > { %v1578_v56 = vpop.eup %1577 }
 0x158   : > { %v2451_v42 = vmul.f32 %v1578_v56, %v1017_v51 }
 0x15a   : > { %1084 = vst [vmem:[#allocation2 + $0x10] sm:$0xff] %v2451_v42  ;;  %1114 = vmatpush.msrb.mxu1 %v2451_v42 }
 0x15b   : > { %1384 = vmatmul.msk.f32.vlgmr.msrb.gmra.mxu1 %vm493_vm0, %v1095_v53 }
 0x1d8   : > { %v1116_v46 = vpop.f32.mrf.mxu1 }
 0x1d9   : > { %v1127_v0 = vadd.f32 %v1126_v62, %v1116_v46  ;;  %v1157_v2 = vadd.f32 %v1155_v45, %v1116_v46 }
 0x1db   : > { %v1130_v35 = vadd.f32 %v1129_v7, %v1127_v0  ;;  %v1163_v43 = vadd.f32 %v1161_v63, %v1157_v2 }
 0x1dd   : > { %v1132_v13 = vadd.f32 %v1131_v5, %v1130_v35  ;;  %v1165_v9 = vadd.f32 %v1164_v8, %v1163_v43 }
 0x1df   : > { %v1390_v14 = vmul.f32 -1.442695, %v1132_v13  ;;  %v1391_v18 = vmul.f32 -1.442695, %v1165_v9 }
 0x1e1   : > { %1579 = vpow2.f32 %v1390_v14 }
 0x1e2   : > { %1581 = vpow2.f32 %v1391_v18 }
 0x1e7   : > { %v1580_v22 = vpop.eup %1579 }
 0x1e8   : > { %v1582_v59 = vpop.eup %1581  ;;  %v1136_v28 = vadd.f32 1.0, %v1580_v22 }
 0x1e9   : > { %v1169_v6 = vadd.f32 1.0, %v1582_v59 }
 0x1ea   : > { %1583 = vrcp.f32 %v1136_v28  ;;  %v1148_v50 = vand.u32 2147483648, %v1136_v28  ;;  %v1146_v27 = vand.u32 2147483647, %v1136_v28  ;;  %vm1142_vm5 = vweird.f32 %v1136_v28 }
 0x1eb   : > { %1585 = vrcp.f32 %v1169_v6  ;;  %v1181_v40 = vand.u32 2147483648, %v1169_v6  ;;  %v1179_v15 = vand.u32 2147483647, %v1169_v6  ;;  %vm1175_vm7 = vweird.f32 %v1169_v6 }
 0x1ec   : > { %v1149_v1 = vor.u32 1.1754944e-38, %v1148_v50  ;;  %vm1147_vm8 = vcmp.eq.f32.partialorder %v1146_v27, 8.507059e+37 }
 0x1ed   : > { %v1182_v36 = vor.u32 1.1754944e-38, %v1181_v40  ;;  %vm1180_vm10 = vcmp.eq.f32.partialorder %v1179_v15, 8.507059e+37 }
 0x1f0   : > { %v1584_v10 = vpop.eup %1583 }
 0x1f1   : > { %v1586_v17 = vpop.eup %1585  ;;  %v1138_v16 = vmul.f32 %v1584_v10, %v1136_v28  ;;  %vm1143_vm0 = vweird.f32 %v1584_v10 }
 0x1f2   : > { %v1171_v26 = vmul.f32 %v1586_v17, %v1169_v6  ;;  %vm1176_vm4 = vweird.f32 %v1586_v17  ;;  %vm1144_vm6 = vmor %vm1142_vm5, %vm1143_vm0 }
 0x1f3   : > { %v1139_v29 = vsub.f32 1.0, %v1138_v16  ;;  %vm1177_vm9 = vmor %vm1175_vm7, %vm1176_vm4 }
 0x1f4   : > { %v1172_v49 = vsub.f32 1.0, %v1171_v26 }
 0x1f5   : > { %v1140_v52 = vmul.f32 %v1584_v10, %v1139_v29 }
 0x1f6   : > { %v1173_v58 = vmul.f32 %v1586_v17, %v1172_v49 }
 0x1f7   : > { %v1141_v33 = vadd.f32 %v1584_v10, %v1140_v52 }
 0x1f8   : > { %v1174_v20 = vadd.f32 %v1586_v17, %v1173_v58 }
 0x1f9   : > { %v1145_v19 = vsel %vm1144_vm6, %v1584_v10, %v1141_v33 }
 0x1fa   : > { %v1150_v32 = vsel %vm1147_vm8, %v1149_v1, %v1145_v19  ;;  %v1178_v37 = vsel %vm1177_vm9, %v1586_v17, %v1174_v20 }
 0x1fb   : > { %v1183_v38 = vsel %vm1180_vm10, %v1182_v36, %v1178_v37  ;;  %1191 = vst [vmem:[#allocation4] sm:$0x1] %v1150_v32  ;;  %v1185_v47 = vmul.f32 %v1150_v32, %v2459_v12 }
 0x1fc   : > { %v1186_v41 = vmul.f32 %v2111_v11, %v1183_v38  ;;  %1192 = vst [vmem:[#allocation5 - $0x1] sm:$0x2] %v1183_v38 }
 0x1fe   : > { %v1188_v25 = vrot.slane %v1186_v41, 1  ;;  %1197 = sbr.rel (%p1392_p1) target bundleno = 520 (0x208), region = 52 }
 0x200   : > { %v1190_v34 = vsub.f32 %v1185_v47, %v1188_v25 }
 0x202   : > { %1193 = vst [vmem:[#allocation6] sm:$0x1] %v1190_v34 }
 0x203   : > { %1198 = vst [vmem:[%s1891_s21] sm:$0xff] %v2451_v42 }
 0x204   : > { %1199 = vst [vmem:[%s1891_s21 + $0x8] sm:$0xff] %v2275_v39 }
 0x205   : > { %1200 = vst [vmem:[%s1891_s21 + $0x10] sm:$0xff] %v2440_v48 }
 0x206   : > { %1201 = vst [vmem:[%s1891_s21 + $0x18] sm:$0xff] %v2424_v31 }
 0x207   : > { %1202 = vst [vmem:[%s2550_s20] sm:$0x1] %v1190_v34 }
 0x208 PF: > { %s1394_s1 = sshll.u32 %s1727_s19, 3  ;;  %s1219_s25 = sshll.u32 %s1891_s21, 4  ;;  %s1220_s25 = int_to_ptr.vmem [resolvable:$true] %s1219_s25 }
 0x209   : > { %s1218_s30 = scalar_lea.hbm %s2544_s8, %s1394_s1  ;;  %s1204_s26 = scalar_lea.sflag [#allocation11], %s1875_s11 }
 0x20a   : > { %s1221_s16 = sshll.u32 %s1218_s30, 4  ;;  %s1631_s23 = scalar_lea.hbm %s2544_s8, 64  ;;  %s1222_s16 = int_to_ptr.hbm [resolvable:$true] %s1221_s16 }
 0x20b   : > { %s1625_s12 = sshra.s32 %s1222_s16, 4  ;;  %s1626_s12 = int_to_ptr.hbm [resolvable:$true] %s1625_s12 }
 0x20c   : > { %s1627_s13 = scalar_lea.hbm %s1626_s12, 32  ;;  %p1632_p6 = scmp.lt.s32.totalorder %s1626_s12, %s2544_s8 }
 0x20d   : > { %p1628_p2 = scmp.ne.s32.totalorder %s1626_s12, %s1627_s13  ;;  %p1633_p7 = scmp.lt.s32.totalorder %s1631_s23, %s1627_s13 }
 0x20f   : > { %p1629_p4 = pnand %p1628_p2, %p1854_p3  ;;  %p1634_p8 = por %p1633_p7, %p1632_p6 }
 0x211   : > { %p1630_p5 = pneg %p1629_p4 }
 0x213   : > { %p1635_p10 = pnand %p1634_p8, %p1630_p5 }
 0x215   : > { %1638 = shalt.err (!%p1635_p10)
}
 0x216   : > { %s1746_s21 = smov 128   ;;  %s1747_s1 = smov 256  }
 0x217   : > { %s1748_s24 = smov 8   ;;  %s1233_s14 = scalar_lea.hbm %s2545_s9, %s1727_s19 }
 0x218   : > { %1409 = dma.vmem_to_hbm [thread:$0]  (%p1854_p3), %s1220_s25, 512, %s1222_s16, %s1204_s26, %s1746_s21, %s1747_s1, %s1748_s24  }
 0x219   : > { %s2588_s2 = scalar_lea.vmem [#allocation12], %s1875_s11  ;;  %s1237_s12 = sshll.u32 %s1233_s14, 4  ;;  %s1238_s12 = int_to_ptr.hbm [resolvable:$true] %s1237_s12 }
 0x21a   : > { %s1235_s20 = sshll.u32 %s2588_s2, 4  ;;  %s1209_s13 = scalar_lea.sflag [#allocation13], %s1875_s11  ;;  %s1236_s20 = int_to_ptr.vmem [resolvable:$true] %s1235_s20 }
 0x21b   : > { %s1653_s15 = sshra.s32 %s1238_s12, 4  ;;  %s1659_s25 = scalar_lea.hbm %s2545_s9, 2  ;;  %s1654_s15 = int_to_ptr.hbm [resolvable:$true] %s1653_s15 }
 0x21c   : > { %s1655_s23 = scalar_lea.hbm %s1654_s15, 1  ;;  %p1660_p0 = scmp.lt.s32.totalorder %s1654_s15, %s2545_s9 }
 0x21d   : > { %p1656_p11 = scmp.ne.s32.totalorder %s1654_s15, %s1655_s23  ;;  %p1661_p1 = scmp.lt.s32.totalorder %s1659_s25, %s1655_s23 }
 0x21f   : > { %p1657_p12 = pnand %p1656_p11, %p1854_p3  ;;  %p1662_p2 = por %p1661_p1, %p1660_p0 }
 0x221   : > { %p1658_p13 = pneg %p1657_p12 }
 0x223   : > { %p1663_p4 = pnand %p1662_p2, %p1658_p13 }
 0x225   : > { %1666 = shalt.err (!%p1663_p4)
}
 0x226   : > { %1410 = dma.vmem_to_hbm [thread:$0]  (%p1854_p3), %s1236_s20, 16, %s1238_s12, %s1209_s13  }
 0x227 PF: > { %p1420_p5 = scmp.ge.s32.totalorder %s1739_s22, 2  ;;  %s1249_s19 = sand.u32 1, %s1711_s17  }
 0x228   : > { %s1250_s3 = scalar_lea.sflag [#allocation11], %s1249_s19 }
 0x229   : > { %p1414_p6 = pnand %p1420_p5, %p1864_p9 }
 0x22b   : > { %p1415_p7 = pneg %p1414_p6 }
 0x22d   : > { %1702 = dma.done.wait (%p1415_p7), %s1250_s3, 512  }
 0x22e   : > { %1704 = vsyncadd (%p1415_p7), %s1250_s3, 4294966784  ;;  %s1260_s4 = scalar_lea.sflag [#allocation13], %s1249_s19 }
 0x22f   : > { %1706 = dma.done.wait (%p1415_p7), %s1260_s4, 16  }
 0x230   : > { %1708 = vsyncadd (%p1415_p7), %s1260_s4, 4294967280  ;;  %s39_s22 = sadd.s32 1, %s1739_s22   ;;  %s2589_s1 = sld [smem:[#allocation17_spill]] }
 0x231   : > { %p36_p8 = scmp.ge.s32.totalorder %s39_s22, 10   ;;  %s2590_s19 = sld [smem:[#allocation18_spill]] }
 0x232   : > { %s2591_s20 = sld [smem:[#allocation19_spill]]  ;;  %s2593_s17 = smov %s1715_s0 }
 0x233   : > { %s2592_s21 = sld [smem:[#allocation20_spill]]  ;;  %s2594_s0 = smov %s1719_s18 }
 0x234   : > { %s2595_s18 = smov %s1872_s10  ;;  %38 = sbr.rel (!%p36_p8) target bundleno = 16 (0x10), region = 107 }
 0x239   :  { %1265 = vsyncpa [#allocation11], 1 }
 0x23a   :  { %1267 = vsyncpa [#allocation11 + $0x1], 1 }
 0x23b   :  { %1268 = vsyncpa [#allocation13], 1 }
 0x23c   :  { %1270 = vsyncpa [#allocation13 + $0x1], 1 }

</bundles_post_ra>
